<compile_context>
chip_gen: v6e
topology: v6e:2x2x1
jax: 0.10.0
libtpu: 0.0.40
codegen_flags: <defaults>
</compile_context>

<pallas_src>
import jax
import jax.numpy as jnp
import numpy as np
from jax.experimental import pallas as pl
from jax.experimental.pallas import tpu as pltpu


def _decoder_kernel(scal_ref, z_ref, wc1e_ref, w2e_ref, wc2e_ref, wc3e_ref,
                    bias_ref, out_ref, h_ref):
    # z block: (1, 64, TL) -> (64, TL); the TL locations sit on the lane axis.
    z = z_ref[0]
    mxu_dtype = wc1e_ref.dtype

    # Stage 1: per-channel Linear(1,8)+ReLU on the VPU in f32, stored as eight
    # contiguous 64-row slabs of the stacked activation H (rows j*64 + c).
    for j in range(8):
        hj = jnp.maximum(z * scal_ref[j] + scal_ref[8 + j], 0.0)      # (64, TL)
        h_ref[j * 64:(j + 1) * 64, :] = hj.astype(h_ref.dtype)

    # Stage 2: conv0 (64->16) per hidden j as ONE K=512 MXU dot, kron(I8, wc1).
    # Output rows ordered (j, o) = j*16 + o.
    g = jnp.dot(wc1e_ref[...], h_ref[...],
                preferred_element_type=jnp.float32)                    # (128, TL)

    # Stage 3: Linear(8,21) folded after the channel contraction, kron(w2, I16);
    # bias = conv0_b + fc1_b folded through wc1 row-sums.
    y1 = jnp.maximum(
        jnp.dot(w2e_ref[...], g.astype(mxu_dtype),
                preferred_element_type=jnp.float32)
        + bias_ref[0:336, :], 0.0)                                     # (336, TL), rows (k,o)

    # Stage 4: conv1 16->4, kron(I21, wc2).
    y2 = jnp.maximum(
        jnp.dot(wc2e_ref[...], y1.astype(mxu_dtype),
                preferred_element_type=jnp.float32)
        + bias_ref[336:420, :], 0.0)                                   # (84, TL), rows (k,p)

    # Stage 5: conv2 4->1, kron(I21, wc3).
    y3 = (jnp.dot(wc3e_ref[...], y2.astype(mxu_dtype),
                  preferred_element_type=jnp.float32)
          + bias_ref[424:445, :])                                      # (21, TL)

    out_ref[0] = jax.nn.sigmoid(y3)                                    # lane-dense store


def _pick_lane_tile(L, B, tl_max):
    # Full-dim lane tile when L fits, else a multiple-of-128 lane tile.
    tl = L if L <= tl_max else tl_max
    # v7x has 2 TensorCores: keep >= 4 grid steps for small batches, but only
    # when the split still yields a multiple-of-128 lane tile.
    while B * pl.cdiv(L, tl) < 4 and tl >= 512 and tl % 256 == 0:
        tl //= 2
    return tl


def decoder_forward(z, params, *, tl_max=1024, use_bf16=True):
    """z: (B, 64, L) -> (B, L, 21), matching PyTorch Decoder.forward."""
    B, C, L = z.shape
    assert C == 64, "Decoder expects 64 input channels"
    f32 = jnp.float32
    mxu_dtype = jnp.bfloat16 if use_bf16 else f32
    z = z.astype(f32)

    TL = _pick_lane_tile(L, B, tl_max)
    num_lt = pl.cdiv(L, TL)

    w1 = params["fc0_w"].reshape(8).astype(f32)
    b1 = params["fc0_b"].reshape(8).astype(f32)
    w2 = params["fc1_w"].astype(f32)                       # (21, 8)
    b2 = params["fc1_b"].astype(f32)                       # (21,)
    wc1 = params["conv0_w"].reshape(16, 64).astype(f32)
    bc1 = params["conv0_b"].astype(f32)                    # (16,)
    wc2 = params["conv1_w"].reshape(4, 16).astype(f32)
    bc2 = params["conv1_b"].astype(f32)                    # (4,)
    wc3 = params["conv2_w"].reshape(1, 4).astype(f32)
    bc3 = params["conv2_b"].reshape(1).astype(f32)         # (1,)

    # fc0 scalars (w1 ++ b1) live in SMEM and broadcast against vector tiles.
    scal = jnp.concatenate([w1, b1])                       # (16,)

    # Structured (kron) weights so every contraction is one 2-D MXU dot over
    # flattened feature rows with l on the lane axis. MXU operands in bf16
    # (f32 accumulation in the kernel) when use_bf16=True.
    wc1e = jnp.kron(jnp.eye(8, dtype=f32), wc1).astype(mxu_dtype)    # (128, 512): rows (j,o), cols (j,c)
    w2e = jnp.kron(w2, jnp.eye(16, dtype=f32)).astype(mxu_dtype)     # (336, 128): rows (k,o), cols (j,o)
    wc2e = jnp.kron(jnp.eye(21, dtype=f32), wc2).astype(mxu_dtype)   # (84, 336):  rows (k,p), cols (k,o)
    wc3e = jnp.kron(jnp.eye(21, dtype=f32), wc3).astype(mxu_dtype)   # (21, 84):   rows  k,    cols (k,p)

    # conv0 bias with the Linear(8,21) bias folded through the 64-channel sum.
    ebc1 = b2[:, None] * jnp.sum(wc1, axis=1)[None, :] + bc1[None, :]   # (21, 16)
    biases = jnp.zeros((448, 1), f32)
    biases = biases.at[0:336, 0].set(ebc1.reshape(336))     # rows k*16+o
    biases = biases.at[336:420, 0].set(jnp.tile(bc2, 21))   # rows k*4+p
    biases = biases.at[424:445, 0].set(jnp.broadcast_to(bc3, (21,)))

    def const_spec(a):
        nd = a.ndim
        return pl.BlockSpec(a.shape, lambda b, t, _nd=nd: (0,) * _nd)

    macs_per_loc = 8 * 64 + 8 * 16 * 64 + 21 * 8 * 16 + 21 * 4 * 16 + 21 * 4
    cost = pl.CostEstimate(
        flops=int(B) * int(L) * 2 * macs_per_loc,
        transcendentals=int(B) * int(L) * 21,
        bytes_accessed=int(B) * int(L) * (64 + 21) * 4,
    )

    out_bl = pl.pallas_call(
        _decoder_kernel,
        out_shape=jax.ShapeDtypeStruct((B, 21, L), f32),
        grid=(B, num_lt),
        in_specs=[
            pl.BlockSpec(memory_space=pltpu.MemorySpace.SMEM),   # fc0 scalars
            pl.BlockSpec((1, 64, TL), lambda b, t: (b, 0, t)),   # z tile
            const_spec(wc1e),
            const_spec(w2e),
            const_spec(wc2e),
            const_spec(wc3e),
            const_spec(biases),
        ],
        out_specs=pl.BlockSpec((1, 21, TL), lambda b, t: (b, 0, t)),
        scratch_shapes=[pltpu.VMEM((512, TL), mxu_dtype)],       # stacked H
        compiler_params=pltpu.CompilerParams(
            dimension_semantics=("parallel", "parallel"),
            vmem_limit_bytes=32 * 1024 * 1024,
        ),
        cost_estimate=cost,
    )(scal, z, wc1e, w2e, wc2e, wc3e, biases)

    return jnp.transpose(out_bl, (0, 2, 1))                  # (B, L, 21)


def decoder_ref(z, params):
    """Pure-JAX reference mirroring the PyTorch module exactly."""
    zf = z[..., None]                                                       # (B, 64, L, 1)
    h = jax.nn.relu(zf @ params["fc0_w"].T + params["fc0_b"])               # (B, 64, L, 8)
    x1 = h @ params["fc1_w"].T + params["fc1_b"]                            # (B, 64, L, 21)

    def conv1x1(x, w, b):
        return jnp.einsum("bchw,oc->bohw", x, w[:, :, 0, 0]) + b[None, :, None, None]

    y = jax.nn.relu(conv1x1(x1, params["conv0_w"], params["conv0_b"]))
    y = jax.nn.relu(conv1x1(y, params["conv1_w"], params["conv1_b"]))
    y = conv1x1(y, params["conv2_w"], params["conv2_b"])                    # (B, 1, L, 21)
    return jax.nn.sigmoid(y[:, 0])                                          # (B, L, 21)


def init_params(key):
    ks = jax.random.split(key, 10)

    def u(k, shape, fan_in):
        bound = 1.0 / np.sqrt(fan_in)
        return jax.random.uniform(k, shape, jnp.float32, -bound, bound)

    return {
        "fc0_w": u(ks[0], (8, 1), 1),
        "fc0_b": u(ks[1], (8,), 1),
        "fc1_w": u(ks[2], (21, 8), 8),
        "fc1_b": u(ks[3], (21,), 8),
        "conv0_w": u(ks[4], (16, 64, 1, 1), 64),
        "conv0_b": u(ks[5], (16,), 64),
        "conv1_w": u(ks[6], (4, 16, 1, 1), 16),
        "conv1_b": u(ks[7], (4,), 16),
        "conv2_w": u(ks[8], (1, 4, 1, 1), 4),
        "conv2_b": u(ks[9], (1,), 4),
    }


if __name__ == "__main__":
    key = jax.random.PRNGKey(0)
    kp, kz = jax.random.split(key)
    params = init_params(kp)

    B, C, L = 2, 64, 8
    z = jax.random.normal(kz, (B, C, L), jnp.float32)

    ref = decoder_ref(z, params)

    # Exact-math path (f32 MXU operands): tight tolerance.
    out_f32 = jax.block_until_ready(decoder_forward(z, params, use_bf16=False))
    assert out_f32.shape == (B, L, 21)
    np.testing.assert_allclose(np.asarray(out_f32), np.asarray(ref),
                               rtol=1e-4, atol=1e-4)

    # Production path (bf16 MXU operands, f32 accumulation): looser tolerance.
    out = jax.block_until_ready(decoder_forward(z, params))
    assert out.shape == (B, L, 21)
    np.testing.assert_allclose(np.asarray(out), np.asarray(ref),
                               rtol=3e-2, atol=3e-2)

    print("KERNEL_OK")
</pallas_src>

<mosaic_0001>
module attributes {stable_mosaic.version = 11 : i64} {
  func.func @_decoder_kernel(%arg0: i32, %arg1: i32, %arg2: memref<16xf32, #tpu.memory_space<smem>>, %arg3: memref<1x64x8xf32, #tpu.memory_space<vmem>>, %arg4: memref<128x512xf32, #tpu.memory_space<vmem>>, %arg5: memref<336x128xf32, #tpu.memory_space<vmem>>, %arg6: memref<84x336xf32, #tpu.memory_space<vmem>>, %arg7: memref<21x84xf32, #tpu.memory_space<vmem>>, %arg8: memref<448x1xf32, #tpu.memory_space<vmem>>, %arg9: memref<1x21x8xf32, #tpu.memory_space<vmem>>, %arg10: memref<512x8xf32, #tpu.memory_space<vmem>>) attributes {dimension_semantics = [#tpu.dimension_semantics<parallel>, #tpu.dimension_semantics<parallel>], iteration_bounds = array<i64: 2, 1>, scalar_prefetch = 0 : i64, scratch_operands = 1 : i64, tpu.core_type = #tpu.core_type<tc>, window_params = [{transform_indices = @transform_0, window_bounds = array<i64: 16>}, {transform_indices = @transform_1, window_bounds = array<i64: 1, 64, 8>}, {pipeline_mode = #tpu.pipeline_mode<synchronous>, transform_indices = @transform_2, window_bounds = array<i64: 128, 512>}, {pipeline_mode = #tpu.pipeline_mode<synchronous>, transform_indices = @transform_3, window_bounds = array<i64: 336, 128>}, {pipeline_mode = #tpu.pipeline_mode<synchronous>, transform_indices = @transform_4, window_bounds = array<i64: 84, 336>}, {pipeline_mode = #tpu.pipeline_mode<synchronous>, transform_indices = @transform_5, window_bounds = array<i64: 21, 84>}, {pipeline_mode = #tpu.pipeline_mode<synchronous>, transform_indices = @transform_6, window_bounds = array<i64: 448, 1>}, {transform_indices = @transform_7, window_bounds = array<i64: 1, 21, 8>}]} {
    %c0 = arith.constant 0 : index
    %c0_0 = arith.constant 0 : index
    %c0_1 = arith.constant 0 : index
    %0 = vector.load %arg3[%c0, %c0_0, %c0_1] : memref<1x64x8xf32, #tpu.memory_space<vmem>>, vector<1x64x8xf32>
    %1 = vector.shape_cast %0 : vector<1x64x8xf32> to vector<64x8xf32>
    %c0_2 = arith.constant 0 : index
    %2 = memref.load %arg2[%c0_2] : memref<16xf32, #tpu.memory_space<smem>>
    %3 = vector.broadcast %2 : f32 to vector<64x8xf32>
    %4 = arith.mulf %1, %3 : vector<64x8xf32>
    %c8 = arith.constant 8 : index
    %5 = memref.load %arg2[%c8] : memref<16xf32, #tpu.memory_space<smem>>
    %6 = vector.broadcast %5 : f32 to vector<64x8xf32>
    %7 = arith.addf %4, %6 : vector<64x8xf32>
    %cst = arith.constant 0.000000e+00 : f32
    %8 = vector.broadcast %cst : f32 to vector<64x8xf32>
    %9 = arith.maximumf %7, %8 : vector<64x8xf32>
    %c0_3 = arith.constant 0 : index
    %c0_4 = arith.constant 0 : index
    %10 = vector.load %arg10[%c0_3, %c0_4] : memref<512x8xf32, #tpu.memory_space<vmem>>, vector<64x8xf32>
    tpu.vector_store %arg10[%c0_3, %c0_4], %9 {strides = array<i32>} : memref<512x8xf32, #tpu.memory_space<vmem>>, vector<64x8xf32>,
    %c1 = arith.constant 1 : index
    %11 = memref.load %arg2[%c1] : memref<16xf32, #tpu.memory_space<smem>>
    %12 = vector.broadcast %11 : f32 to vector<64x8xf32>
    %13 = arith.mulf %1, %12 : vector<64x8xf32>
    %c9 = arith.constant 9 : index
    %14 = memref.load %arg2[%c9] : memref<16xf32, #tpu.memory_space<smem>>
    %15 = vector.broadcast %14 : f32 to vector<64x8xf32>
    %16 = arith.addf %13, %15 : vector<64x8xf32>
    %cst_5 = arith.constant 0.000000e+00 : f32
    %17 = vector.broadcast %cst_5 : f32 to vector<64x8xf32>
    %18 = arith.maximumf %16, %17 : vector<64x8xf32>
    %c64 = arith.constant 64 : index
    %c0_6 = arith.constant 0 : index
    %19 = vector.load %arg10[%c64, %c0_6] : memref<512x8xf32, #tpu.memory_space<vmem>>, vector<64x8xf32>
    tpu.vector_store %arg10[%c64, %c0_6], %18 {strides = array<i32>} : memref<512x8xf32, #tpu.memory_space<vmem>>, vector<64x8xf32>,
    %c2 = arith.constant 2 : index
    %20 = memref.load %arg2[%c2] : memref<16xf32, #tpu.memory_space<smem>>
    %21 = vector.broadcast %20 : f32 to vector<64x8xf32>
    %22 = arith.mulf %1, %21 : vector<64x8xf32>
    %c10 = arith.constant 10 : index
    %23 = memref.load %arg2[%c10] : memref<16xf32, #tpu.memory_space<smem>>
    %24 = vector.broadcast %23 : f32 to vector<64x8xf32>
    %25 = arith.addf %22, %24 : vector<64x8xf32>
    %cst_7 = arith.constant 0.000000e+00 : f32
    %26 = vector.broadcast %cst_7 : f32 to vector<64x8xf32>
    %27 = arith.maximumf %25, %26 : vector<64x8xf32>
    %c128 = arith.constant 128 : index
    %c0_8 = arith.constant 0 : index
    %28 = vector.load %arg10[%c128, %c0_8] : memref<512x8xf32, #tpu.memory_space<vmem>>, vector<64x8xf32>
    tpu.vector_store %arg10[%c128, %c0_8], %27 {strides = array<i32>} : memref<512x8xf32, #tpu.memory_space<vmem>>, vector<64x8xf32>,
    %c3 = arith.constant 3 : index
    %29 = memref.load %arg2[%c3] : memref<16xf32, #tpu.memory_space<smem>>
    %30 = vector.broadcast %29 : f32 to vector<64x8xf32>
    %31 = arith.mulf %1, %30 : vector<64x8xf32>
    %c11 = arith.constant 11 : index
    %32 = memref.load %arg2[%c11] : memref<16xf32, #tpu.memory_space<smem>>
    %33 = vector.broadcast %32 : f32 to vector<64x8xf32>
    %34 = arith.addf %31, %33 : vector<64x8xf32>
    %cst_9 = arith.constant 0.000000e+00 : f32
    %35 = vector.broadcast %cst_9 : f32 to vector<64x8xf32>
    %36 = arith.maximumf %34, %35 : vector<64x8xf32>
    %c192 = arith.constant 192 : index
    %c0_10 = arith.constant 0 : index
    %37 = vector.load %arg10[%c192, %c0_10] : memref<512x8xf32, #tpu.memory_space<vmem>>, vector<64x8xf32>
    tpu.vector_store %arg10[%c192, %c0_10], %36 {strides = array<i32>} : memref<512x8xf32, #tpu.memory_space<vmem>>, vector<64x8xf32>,
    %c4 = arith.constant 4 : index
    %38 = memref.load %arg2[%c4] : memref<16xf32, #tpu.memory_space<smem>>
    %39 = vector.broadcast %38 : f32 to vector<64x8xf32>
    %40 = arith.mulf %1, %39 : vector<64x8xf32>
    %c12 = arith.constant 12 : index
    %41 = memref.load %arg2[%c12] : memref<16xf32, #tpu.memory_space<smem>>
    %42 = vector.broadcast %41 : f32 to vector<64x8xf32>
    %43 = arith.addf %40, %42 : vector<64x8xf32>
    %cst_11 = arith.constant 0.000000e+00 : f32
    %44 = vector.broadcast %cst_11 : f32 to vector<64x8xf32>
    %45 = arith.maximumf %43, %44 : vector<64x8xf32>
    %c256 = arith.constant 256 : index
    %c0_12 = arith.constant 0 : index
    %46 = vector.load %arg10[%c256, %c0_12] : memref<512x8xf32, #tpu.memory_space<vmem>>, vector<64x8xf32>
    tpu.vector_store %arg10[%c256, %c0_12], %45 {strides = array<i32>} : memref<512x8xf32, #tpu.memory_space<vmem>>, vector<64x8xf32>,
    %c5 = arith.constant 5 : index
    %47 = memref.load %arg2[%c5] : memref<16xf32, #tpu.memory_space<smem>>
    %48 = vector.broadcast %47 : f32 to vector<64x8xf32>
    %49 = arith.mulf %1, %48 : vector<64x8xf32>
    %c13 = arith.constant 13 : index
    %50 = memref.load %arg2[%c13] : memref<16xf32, #tpu.memory_space<smem>>
    %51 = vector.broadcast %50 : f32 to vector<64x8xf32>
    %52 = arith.addf %49, %51 : vector<64x8xf32>
    %cst_13 = arith.constant 0.000000e+00 : f32
    %53 = vector.broadcast %cst_13 : f32 to vector<64x8xf32>
    %54 = arith.maximumf %52, %53 : vector<64x8xf32>
    %c320 = arith.constant 320 : index
    %c0_14 = arith.constant 0 : index
    %55 = vector.load %arg10[%c320, %c0_14] : memref<512x8xf32, #tpu.memory_space<vmem>>, vector<64x8xf32>
    tpu.vector_store %arg10[%c320, %c0_14], %54 {strides = array<i32>} : memref<512x8xf32, #tpu.memory_space<vmem>>, vector<64x8xf32>,
    %c6 = arith.constant 6 : index
    %56 = memref.load %arg2[%c6] : memref<16xf32, #tpu.memory_space<smem>>
    %57 = vector.broadcast %56 : f32 to vector<64x8xf32>
    %58 = arith.mulf %1, %57 : vector<64x8xf32>
    %c14 = arith.constant 14 : index
    %59 = memref.load %arg2[%c14] : memref<16xf32, #tpu.memory_space<smem>>
    %60 = vector.broadcast %59 : f32 to vector<64x8xf32>
    %61 = arith.addf %58, %60 : vector<64x8xf32>
    %cst_15 = arith.constant 0.000000e+00 : f32
    %62 = vector.broadcast %cst_15 : f32 to vector<64x8xf32>
    %63 = arith.maximumf %61, %62 : vector<64x8xf32>
    %c384 = arith.constant 384 : index
    %c0_16 = arith.constant 0 : index
    %64 = vector.load %arg10[%c384, %c0_16] : memref<512x8xf32, #tpu.memory_space<vmem>>, vector<64x8xf32>
    tpu.vector_store %arg10[%c384, %c0_16], %63 {strides = array<i32>} : memref<512x8xf32, #tpu.memory_space<vmem>>, vector<64x8xf32>,
    %c7 = arith.constant 7 : index
    %65 = memref.load %arg2[%c7] : memref<16xf32, #tpu.memory_space<smem>>
    %66 = vector.broadcast %65 : f32 to vector<64x8xf32>
    %67 = arith.mulf %1, %66 : vector<64x8xf32>
    %c15 = arith.constant 15 : index
    %68 = memref.load %arg2[%c15] : memref<16xf32, #tpu.memory_space<smem>>
    %69 = vector.broadcast %68 : f32 to vector<64x8xf32>
    %70 = arith.addf %67, %69 : vector<64x8xf32>
    %cst_17 = arith.constant 0.000000e+00 : f32
    %71 = vector.broadcast %cst_17 : f32 to vector<64x8xf32>
    %72 = arith.maximumf %70, %71 : vector<64x8xf32>
    %c448 = arith.constant 448 : index
    %c0_18 = arith.constant 0 : index
    %73 = vector.load %arg10[%c448, %c0_18] : memref<512x8xf32, #tpu.memory_space<vmem>>, vector<64x8xf32>
    tpu.vector_store %arg10[%c448, %c0_18], %72 {strides = array<i32>} : memref<512x8xf32, #tpu.memory_space<vmem>>, vector<64x8xf32>,
    %c0_19 = arith.constant 0 : index
    %c0_20 = arith.constant 0 : index
    %74 = vector.load %arg4[%c0_19, %c0_20] : memref<128x512xf32, #tpu.memory_space<vmem>>, vector<128x512xf32>
    %c0_21 = arith.constant 0 : index
    %c0_22 = arith.constant 0 : index
    %75 = vector.load %arg10[%c0_21, %c0_22] : memref<512x8xf32, #tpu.memory_space<vmem>>, vector<512x8xf32>
    %cst_23 = arith.constant dense<0.000000e+00> : vector<128x8xf32>
    %76 = tpu.matmul %74, %75, %cst_23 {dimension_numbers = #tpu.dot_dimension_numbers<[1], [0], [0], [1], [0, 0, 1, 1], [], []>} : vector<128x512xf32>, vector<512x8xf32>, vector<128x8xf32> -> vector<128x8xf32>
    %c0_24 = arith.constant 0 : index
    %c0_25 = arith.constant 0 : index
    %77 = vector.load %arg5[%c0_24, %c0_25] : memref<336x128xf32, #tpu.memory_space<vmem>>, vector<336x128xf32>
    %cst_26 = arith.constant dense<0.000000e+00> : vector<336x8xf32>
    %78 = tpu.matmul %77, %76, %cst_26 {dimension_numbers = #tpu.dot_dimension_numbers<[1], [0], [0], [1], [0, 0, 1, 1], [], []>} : vector<336x128xf32>, vector<128x8xf32>, vector<336x8xf32> -> vector<336x8xf32>
    %c0_27 = arith.constant 0 : index
    %c0_28 = arith.constant 0 : index
    %79 = vector.load %arg8[%c0_27, %c0_28] : memref<448x1xf32, #tpu.memory_space<vmem>>, vector<336x1xf32>
    %80 = vector.broadcast %79 : vector<336x1xf32> to vector<336x8xf32>
    %81 = arith.addf %78, %80 : vector<336x8xf32>
    %cst_29 = arith.constant 0.000000e+00 : f32
    %82 = vector.broadcast %cst_29 : f32 to vector<336x8xf32>
    %83 = arith.maximumf %81, %82 : vector<336x8xf32>
    %c0_30 = arith.constant 0 : index
    %c0_31 = arith.constant 0 : index
    %84 = vector.load %arg6[%c0_30, %c0_31] : memref<84x336xf32, #tpu.memory_space<vmem>>, vector<84x336xf32>
    %cst_32 = arith.constant dense<0.000000e+00> : vector<84x8xf32>
    %85 = tpu.matmul %84, %83, %cst_32 {dimension_numbers = #tpu.dot_dimension_numbers<[1], [0], [0], [1], [0, 0, 1, 1], [], []>} : vector<84x336xf32>, vector<336x8xf32>, vector<84x8xf32> -> vector<84x8xf32>
    %c336 = arith.constant 336 : index
    %c0_33 = arith.constant 0 : index
    %86 = vector.load %arg8[%c336, %c0_33] : memref<448x1xf32, #tpu.memory_space<vmem>>, vector<84x1xf32>
    %87 = vector.broadcast %86 : vector<84x1xf32> to vector<84x8xf32>
    %88 = arith.addf %85, %87 : vector<84x8xf32>
    %cst_34 = arith.constant 0.000000e+00 : f32
    %89 = vector.broadcast %cst_34 : f32 to vector<84x8xf32>
    %90 = arith.maximumf %88, %89 : vector<84x8xf32>
    %c0_35 = arith.constant 0 : index
    %c0_36 = arith.constant 0 : index
    %91 = vector.load %arg7[%c0_35, %c0_36] : memref<21x84xf32, #tpu.memory_space<vmem>>, vector<21x84xf32>
    %cst_37 = arith.constant dense<0.000000e+00> : vector<21x8xf32>
    %92 = tpu.matmul %91, %90, %cst_37 {dimension_numbers = #tpu.dot_dimension_numbers<[1], [0], [0], [1], [0, 0, 1, 1], [], []>} : vector<21x84xf32>, vector<84x8xf32>, vector<21x8xf32> -> vector<21x8xf32>
    %c424 = arith.constant 424 : index
    %c0_38 = arith.constant 0 : index
    %93 = vector.load %arg8[%c424, %c0_38] : memref<448x1xf32, #tpu.memory_space<vmem>>, vector<21x1xf32>
    %94 = vector.broadcast %93 : vector<21x1xf32> to vector<21x8xf32>
    %95 = arith.addf %92, %94 : vector<21x8xf32>
    %96 = arith.negf %95 : vector<21x8xf32>
    %97 = math.exp %96 : vector<21x8xf32>
    %cst_39 = arith.constant 1.000000e+00 : f32
    %98 = vector.broadcast %cst_39 : f32 to vector<21x8xf32>
    %99 = arith.addf %98, %97 : vector<21x8xf32>
    %100 = arith.divf %98, %99 : vector<21x8xf32>
    %c0_40 = arith.constant 0 : index
    %c0_41 = arith.constant 0 : index
    %c0_42 = arith.constant 0 : index
    %101 = vector.load %arg9[%c0_40, %c0_41, %c0_42] : memref<1x21x8xf32, #tpu.memory_space<vmem>>, vector<1x21x8xf32>
    %102 = vector.shape_cast %101 : vector<1x21x8xf32> to vector<21x8xf32>
    %103 = vector.shape_cast %100 : vector<21x8xf32> to vector<1x21x8xf32>
    tpu.vector_store %arg9[%c0_40, %c0_41, %c0_42], %103 {strides = array<i32>} : memref<1x21x8xf32, #tpu.memory_space<vmem>>, vector<1x21x8xf32>,
    return
  }
  func.func @transform_0(%arg0: i32, %arg1: i32) -> i32 {
    %c0_i32 = arith.constant 0 : i32
    %c0_i32_0 = arith.constant 0 : i32
    return %c0_i32 : i32
  }
  func.func @transform_1(%arg0: i32, %arg1: i32) -> (i32, i32, i32) {
    %c0_i32 = arith.constant 0 : i32
    %c0_i32_0 = arith.constant 0 : i32
    return %arg0, %c0_i32, %arg1 : i32, i32, i32
  }
  func.func @transform_2(%arg0: i32, %arg1: i32) -> (i32, i32) {
    %c0_i32 = arith.constant 0 : i32
    %c0_i32_0 = arith.constant 0 : i32
    %c0_i32_1 = arith.constant 0 : i32
    return %c0_i32, %c0_i32_0 : i32, i32
  }
  func.func @transform_3(%arg0: i32, %arg1: i32) -> (i32, i32) {
    %c0_i32 = arith.constant 0 : i32
    %c0_i32_0 = arith.constant 0 : i32
    %c0_i32_1 = arith.constant 0 : i32
    return %c0_i32, %c0_i32_0 : i32, i32
  }
  func.func @transform_4(%arg0: i32, %arg1: i32) -> (i32, i32) {
    %c0_i32 = arith.constant 0 : i32
    %c0_i32_0 = arith.constant 0 : i32
    %c0_i32_1 = arith.constant 0 : i32
    return %c0_i32, %c0_i32_0 : i32, i32
  }
  func.func @transform_5(%arg0: i32, %arg1: i32) -> (i32, i32) {
    %c0_i32 = arith.constant 0 : i32
    %c0_i32_0 = arith.constant 0 : i32
    %c0_i32_1 = arith.constant 0 : i32
    return %c0_i32, %c0_i32_0 : i32, i32
  }
  func.func @transform_6(%arg0: i32, %arg1: i32) -> (i32, i32) {
    %c0_i32 = arith.constant 0 : i32
    %c0_i32_0 = arith.constant 0 : i32
    %c0_i32_1 = arith.constant 0 : i32
    return %c0_i32, %c0_i32_0 : i32, i32
  }
  func.func @transform_7(%arg0: i32, %arg1: i32) -> (i32, i32, i32) {
    %c0_i32 = arith.constant 0 : i32
    %c0_i32_0 = arith.constant 0 : i32
    return %arg0, %c0_i32, %arg1 : i32, i32, i32
  }
}

</mosaic_0001>

<bundles_post_ra>
// kernel: tpu_custom_call.1
= control target key start
LH: loop header
LB: loop body
LE: loop exit
PB: predicated region body
PF: predicated region fallthrough
CT: control target
= control target key end

     0   :  { %12 = vsyncpa [#allocation5], 0  ;;  %s4253_s0 = inlined_call_operand.vmem [shape: f32[16], index: 0, kind: input, shape index: {}]   ;;  %s4254_s1 = inlined_call_operand.vmem [shape: f32[2,64,8], index: 1, kind: input, shape index: {}]   ;;  %s4255_s2 = inlined_call_operand.vmem [shape: f32[128,512], index: 2, kind: input, shape index: {}]   ;;  %s4256_s3 = inlined_call_operand.hbm [shape: f32[336,128], index: 3, kind: input, shape index: {}]   ;;  %s4257_s4 = inlined_call_operand.hbm [shape: f32[84,336], index: 4, kind: input, shape index: {}]   ;;  %s4258_s5 = inlined_call_operand.vmem [shape: f32[21,84], index: 5, kind: input, shape index: {}]   ;;  %s4259_s6 = inlined_call_operand.vmem [shape: f32[448,1], index: 6, kind: input, shape index: {}]   ;;  %s4260_s7 = inlined_call_operand.vmem [shape: f32[2,21,8], index: 7, kind: output, shape index: {}]  }
   0x1   :  { %13 = vsyncpa [#allocation4], 0 }
   0x2   :  { %14 = vsyncpa [#allocation8], 0  ;;  %s3118_s24 = smov 0   ;;  %s3120_s25 = smov 0  }
   0x3   :  { %s3122_s26 = smov 0  }
   0x4 LB: > { %s2319_s27 = sadd.s32 4294967295, %s3066_s26   ;;  %s32_s28 = sadd.s32 1, %s3062_s25  ;;  %s3066_s26 = sphi %s3122_s26, %s20_s26   ;;  %s3062_s25 = sphi %s3120_s25, %s4287_s25   ;;  %s3058_s24 = sphi %s3118_s24, %s4286_s24  }
   0x5   : > { %p34_p0 = scmp.ge.s32.totalorder %s32_s28, 2  ;;  %p2321_p1 = scmp.ge.s32.totalorder %s3066_s26, 1 }
   0x6   : > { %p219_p2 = scmp.lt.s32.totalorder %s3066_s26, 3  ;;  %p3143_p4 = scmp.eq.s32.totalorder %s2319_s27, 0 }
   0x7   : > { %s4289_s28 = smov (%p34_p0, %s32_s28), 0  ;;  %s232_s10 = sshll.u32 %s4253_s0, 4  ;;  %s233_s10 = int_to_ptr.vmem [resolvable:$true] %s232_s10 }
   0x8   : > { %p3139_p3 = pnand %p2321_p1, %p219_p2  ;;  %s3068_s12 = smov [#allocation6]  }
   0x9   : > { %s4267_s30 = scalar_select %p3143_p4, 1, 0 }
   0xa   : > { %s4266_s29 = scalar_select %p3139_p3, 1, 0 }
   0xb   : > { %p2901_p5 = pneg %p3139_p3  ;;  %s245_s13 = sshll.u32 %s3068_s12, 4  ;;  %s246_s13 = int_to_ptr.vmem [resolvable:$true] %s245_s13 }
   0xc   : > { %s2965_s14 = scalar_lea.vmem %s233_s10, 16  ;;  %p2973_p11 = scmp.lt.s32.totalorder %s233_s10, %s233_s10 }
   0xd   : > { %p3154_p6 = pnand %p3143_p4, %p2901_p5  ;;  %p2966_p7 = scmp.ne.s32.totalorder %s233_s10, %s2965_s14 }
   0xe   : > { %p2974_p12 = scmp.lt.s32.totalorder %s2965_s14, %s2965_s14 }
   0xf   : > { %p2967_p8 = pneg %p3154_p6 }
  0x10   : > { %p2975_p13 = por %p2974_p12, %p2973_p11 }
  0x11   : > { %p2968_p9 = pnand %p2967_p8, %p2966_p7 }
  0x13   : > { %p2969_p10 = pneg %p2968_p9 }
  0x15   : > { %p2976_p0 = pnand %p2975_p13, %p2969_p10 }
  0x17   : > { %2979 = shalt.err (!%p2976_p0)
}
  0x18   : > { %s3069_s15 = smov [#allocation3]   ;;  %s2991_s16 = scalar_lea.vmem %s246_s13, 5376 }
  0x19   : > { %2904 = dma.vmem_to_smem (!%p3154_p6), %s233_s10, 16, %s3069_s15, [#allocation5]  }
  0x1a   : > { %p2992_p1 = scmp.ne.s32.totalorder %s246_s13, %s2991_s16  ;;  %p2999_p4 = scmp.lt.s32.totalorder %s246_s13, %s246_s13 }
  0x1b   : > { %p3000_p3 = scmp.lt.s32.totalorder %s2991_s16, %s2991_s16 }
  0x1c   : > { %p2994_p2 = pnand %p2992_p1, %p2967_p8 }
  0x1d   : > { %p3001_p7 = por %p3000_p3, %p2999_p4 }
  0x1e   : > { %p2995_p5 = pneg %p2994_p2 }
  0x20   : > { %p3002_p9 = pnand %p3001_p7, %p2995_p5 }
  0x22   : > { %3005 = shalt.err (!%p3002_p9)
}
  0x23   : > { %s3070_s17 = smov 128   ;;  %s3071_s18 = smov 8  }
  0x24   : > { %2907 = dma.hbm_to_vmem [thread:$0]  (!%p3154_p6), %s4256_s3, 5376, %s246_s13, [#allocation4], %s3070_s17, %s3070_s17, %s3071_s18  }
  0x25   : > { %s3072_s21 = smov [#allocation7]  }
  0x26   : > { %s258_s22 = sshll.u32 %s3072_s21, 4  ;;  %s259_s22 = int_to_ptr.vmem [resolvable:$true] %s258_s22 }
  0x27   : > { %s3017_s23 = scalar_lea.vmem %s259_s22, 4224  ;;  %p3025_p4 = scmp.lt.s32.totalorder %s259_s22, %s259_s22 }
  0x28   : > { %p3018_p10 = scmp.ne.s32.totalorder %s259_s22, %s3017_s23  ;;  %p3026_p12 = scmp.lt.s32.totalorder %s3017_s23, %s3017_s23 }
  0x2a   : > { %p3020_p11 = pnand %p3018_p10, %p2967_p8  ;;  %p3027_p13 = por %p3026_p12, %p3025_p4 }
  0x2c   : > { %p3021_p3 = pneg %p3020_p11 }
  0x2e   : > { %p3028_p0 = pnand %p3027_p13, %p3021_p3 }
  0x30   : > { %3031 = shalt.err (!%p3028_p0)
}
  0x31   : > { %s3073_s27 = smov 384   ;;  %s3074_s8 = smov 24  }
  0x32   : > { %2910 = dma.hbm_to_vmem [thread:$0]  (!%p3154_p6), %s4257_s4, 4224, %s259_s22, [#allocation8], %s3073_s27, %s3073_s27, %s3074_s8  }
  0x33   : > { %p4269_p1 = scmp.ne.s32.totalorder %s4266_s29, 0 }
  0x35   : > { %291 = sbr.rel (%p4269_p1) target bundleno = 1256 (0x4e8), region = 48 }
  0x3a   : > { %p4270_p2 = scmp.ne.s32.totalorder %s4267_s30, 0 }
  0x3c   : > { %3045 = dma.done.wait (%p4270_p2), [#allocation5], 16  }
  0x3d   : > { %3047 = vsyncadd (%p4270_p2), [#allocation5], 4294967280 }
  0x3e   : > { %3049 = dma.done.wait (%p4270_p2), [#allocation4], 5376  }
  0x3f   : > { %3051 = vsyncadd (%p4270_p2), [#allocation4], 4294961920 }
  0x40   : > { %3053 = dma.done.wait (%p4270_p2), [#allocation8], 4224  }
  0x41   : > { %3055 = vsyncadd (%p4270_p2), [#allocation8], 4294963072 }
  0x42   : > { %305 = sfence }
  0x43   : > { %p338_p6 = scmp.lt.s32.totalorder %s3058_s24, 1  ;;  %s2338_s29 = sld [smem:[#allocation3 + $0x3]]  ;;  %v652_v0 = vld [vmem:[%s4255_s2 + $0x8] sm:$0xff]  ;;  %v654_v1 = vld [vmem:[%s4255_s2 + $0x18] sm:$0xff]  ;;  %vm390_vm0 = vcmask 64512   ;;  %vm3077_vm1 = vmmov 0  }
  0x44   : > { %s2339_s15 = sld [smem:[#allocation3 + $0xb]]  ;;  %843 = vmatprep.mubr.f32.mxu0 %v652_v0  ;;  %988 = vmatprep.mubr.f32.mxu1 %v654_v1  ;;  %vm1779_vm2 = vcmask 654336   ;;  %vm2095_vm3 = vcmask 1043456   ;;  %vm2085_vm4 = vcmask 687104   ;;  %vm2199_vm5 = vcmask 61440  }
  0x45   : > { %s4291_s24 = smov (!%p338_p6, %s3058_s24), 1  ;;  %s2346_s30 = sld [smem:[#allocation3 + $0x7]] }
  0x46   : > { %s2368_s16 = sshll.u32 %s4291_s24, 6  ;;  %s2347_s17 = sld [smem:[#allocation3 + $0xf]] }
  0x47   : > { %s3209_s20 = scalar_lea.vmem %s4254_s1, %s2368_s16  ;;  %s2334_s21 = sld [smem:[#allocation3 + $0x1]] }
  0x48   : > { %v3212_v2 = vld [vmem:[%s3209_s20 + $0x38] sm:$0xff]  ;;  %s2335_s22 = sld [smem:[#allocation3 + $0x9]]  ;;  %v3217_v4 = vld [vmem:[%s3209_s20 + $0x30] sm:$0xff]  ;;  %v3220_v5 = vld [vmem:[%s3209_s20 + $0x28] sm:$0xff] }
  0x49   : > { %v3214_v3 = vstv %s2338_s29  ;;  %s2342_s23 = sld [smem:[#allocation3 + $0x5]]  ;;  %v3231_v10 = vld [vmem:[%s3209_s20 + $0x20] sm:$0xff]  ;;  %v3234_v11 = vld [vmem:[%s3209_s20 + $0x18] sm:$0xff]  ;;  %v3237_v12 = vld [vmem:[%s3209_s20 + $0x10] sm:$0xff] }
  0x4a   : > { %v480_v6 = vmul.f32 %v3214_v3, %v3212_v2  ;;  %v3224_v7 = vstv %s2339_s15  ;;  %v479_v8 = vmul.f32 %v3214_v3, %v3217_v4  ;;  %v478_v9 = vmul.f32 %v3214_v3, %v3220_v5  ;;  %s2343_s27 = sld [smem:[#allocation3 + $0xd]] }
  0x4b   : > { %v477_v13 = vmul.f32 %v3214_v3, %v3231_v10  ;;  %v476_v14 = vmul.f32 %v3214_v3, %v3234_v11  ;;  %v3245_v15 = vmul.f32 %v3214_v3, %v3237_v12  ;;  %v3248_v17 = vstv %s2346_s30  ;;  %s3311_s8 = sld [smem:[#allocation3 + $0x2]] }
  0x4c   : > { %v490_v16 = vadd.f32 %v3224_v7, %v480_v6  ;;  %v489_v18 = vadd.f32 %v3224_v7, %v479_v8  ;;  %v488_v19 = vadd.f32 %v3224_v7, %v478_v9  ;;  %v624_v20 = vmul.f32 %v3248_v17, %v3212_v2  ;;  %s3320_s9 = sld [smem:[#allocation3 + $0xa]] }
  0x4d   : > { %v3254_v21 = vstv %s2347_s17  ;;  %v623_v22 = vmul.f32 %v3248_v17, %v3217_v4  ;;  %v622_v23 = vmul.f32 %v3248_v17, %v3220_v5  ;;  %v3260_v25 = vstv %s2334_s21  ;;  %s3329_s10 = sld [smem:[#allocation3 + $0x6]] }
  0x4e   : > { %v498_v24 = vmax.f32 %v490_v16, 0.0  ;;  %v497_v26 = vmax.f32 %v489_v18, 0.0  ;;  %v496_v27 = vmax.f32 %v488_v19, 0.0  ;;  %v634_v28 = vadd.f32 %v3254_v21, %v624_v20  ;;  %v3327_v19 = vld [vmem:[%s3209_s20 + $0x8] sm:$0xff]  ;;  %s3336_s29 = sld [smem:[#allocation3 + $0xe]] }
  0x4f   : > { %v408_v29 = vmul.f32 %v3260_v25, %v3212_v2  ;;  %v3265_v30 = vstv %s2335_s22  ;;  %v633_v31 = vadd.f32 %v3254_v21, %v623_v22  ;;  %v3269_v32 = vstv %s2342_s23  ;;  %s3347_s11 = sld [smem:[#allocation3]] }
  0x50   : > { %506 = vst.msk [vmem:[#allocation2 + $0xf8] sm:$0xff] %vm390_vm0, %v498_v24  ;;  %505 = vst.msk [vmem:[#allocation2 + $0xf0] sm:$0xff] %vm390_vm0, %v497_v26  ;;  %v407_v33 = vmul.f32 %v3260_v25, %v3217_v4  ;;  %v632_v34 = vadd.f32 %v3254_v21, %v622_v23  ;;  %v406_v35 = vmul.f32 %v3260_v25, %v3220_v5  ;;  %v642_v36 = vmax.f32 %v634_v28, 0.0  ;;  %s3353_s12 = sld [smem:[#allocation3 + $0x8]] }
  0x51   : > { %504 = vst.msk [vmem:[#allocation2 + $0xe8] sm:$0xff] %vm390_vm0, %v496_v27  ;;  %v418_v37 = vadd.f32 %v3265_v30, %v408_v29  ;;  %v552_v38 = vmul.f32 %v3269_v32, %v3212_v2  ;;  %v3281_v39 = vstv %s2343_s27  ;;  %v641_v40 = vmax.f32 %v633_v31, 0.0  ;;  %s3363_s13 = sld [smem:[#allocation3 + $0x4]] }
  0x52   : > { %v417_v41 = vadd.f32 %v3265_v30, %v407_v33  ;;  %v551_v42 = vmul.f32 %v3269_v32, %v3217_v4  ;;  %v640_v43 = vmax.f32 %v632_v34, 0.0  ;;  %650 = vst.msk [vmem:[#allocation2 + $0x1f8] sm:$0xff] %vm390_vm0, %v642_v36  ;;  %v416_v46 = vadd.f32 %v3265_v30, %v406_v35  ;;  %v3345_v33 = vld [vmem:[%s3209_s20] sm:$0xff]  ;;  %s3372_s14 = sld [smem:[#allocation3 + $0xc]] }
  0x53   : > { %v426_v44 = vmax.f32 %v418_v37, 0.0  ;;  %v562_v45 = vadd.f32 %v3281_v39, %v552_v38  ;;  %v550_v47 = vmul.f32 %v3269_v32, %v3220_v5  ;;  %649 = vst.msk [vmem:[#allocation2 + $0x1f0] sm:$0xff] %vm390_vm0, %v641_v40  ;;  %v487_v50 = vadd.f32 %v3224_v7, %v477_v13 }
  0x54   : > { %v425_v48 = vmax.f32 %v417_v41, 0.0  ;;  %v561_v49 = vadd.f32 %v3281_v39, %v551_v42  ;;  %648 = vst.msk [vmem:[#allocation2 + $0x1e8] sm:$0xff] %vm390_vm0, %v640_v43  ;;  %v621_v51 = vmul.f32 %v3248_v17, %v3231_v10  ;;  %v424_v53 = vmax.f32 %v416_v46, 0.0 }
  0x55   : > { %434 = vst.msk [vmem:[#allocation2 + $0x78] sm:$0xff] %vm390_vm0, %v426_v44  ;;  %v570_v52 = vmax.f32 %v562_v45, 0.0  ;;  %v560_v54 = vadd.f32 %v3281_v39, %v550_v47  ;;  %v405_v55 = vmul.f32 %v3260_v25, %v3231_v10  ;;  %v495_v57 = vmax.f32 %v487_v50, 0.0 }
  0x56   : > { %433 = vst.msk [vmem:[#allocation2 + $0x70] sm:$0xff] %vm390_vm0, %v425_v48  ;;  %v569_v56 = vmax.f32 %v561_v49, 0.0  ;;  %v631_v58 = vadd.f32 %v3254_v21, %v621_v51  ;;  %v549_v59 = vmul.f32 %v3269_v32, %v3231_v10  ;;  %432 = vst.msk [vmem:[#allocation2 + $0x68] sm:$0xff] %vm390_vm0, %v424_v53  ;;  %v486_v63 = vadd.f32 %v3224_v7, %v476_v14 }
  0x57   : > { %v746_v60 = vld [vmem:[#allocation2 + $0xf8] sm:$0xff]  ;;  %578 = vst.msk [vmem:[#allocation2 + $0x178] sm:$0xff] %vm390_vm0, %v570_v52  ;;  %v568_v61 = vmax.f32 %v560_v54, 0.0  ;;  %v415_v62 = vadd.f32 %v3265_v30, %v405_v55  ;;  %v620_v0 = vmul.f32 %v3248_v17, %v3234_v11  ;;  %503 = vst.msk [vmem:[#allocation2 + $0xe0] sm:$0xff] %vm390_vm0, %v495_v57  ;;  %v404_v8 = vmul.f32 %v3260_v25, %v3234_v11 }
  0x58   : > { %2369 = vmatprep.subr.mxu0 %v746_v60  ;;  %577 = vst.msk [vmem:[#allocation2 + $0x170] sm:$0xff] %vm390_vm0, %v569_v56  ;;  %v639_v1 = vmax.f32 %v631_v58, 0.0  ;;  %v559_v6 = vadd.f32 %v3281_v39, %v549_v59  ;;  %v548_v9 = vmul.f32 %v3269_v32, %v3234_v11  ;;  %v494_v14 = vmax.f32 %v486_v63, 0.0  ;;  %v744_v42 = vld [vmem:[#allocation2 + $0xe8] sm:$0xff] }
  0x59   : > { %576 = vst.msk [vmem:[#allocation2 + $0x168] sm:$0xff] %vm390_vm0, %v568_v61  ;;  %v423_v13 = vmax.f32 %v415_v62, 0.0  ;;  %v630_v16 = vadd.f32 %v3254_v21, %v620_v0  ;;  %v485_v18 = vadd.f32 %v3224_v7, %v3245_v15  ;;  %v778_v20 = vld [vmem:[#allocation2 + $0x1f8] sm:$0xff]  ;;  %v414_v23 = vadd.f32 %v3265_v30, %v404_v8  ;;  %v745_v15 = vld [vmem:[#allocation2 + $0xf0] sm:$0xff] }
  0x5a   : > { %647 = vst.msk [vmem:[#allocation2 + $0x1e0] sm:$0xff] %vm390_vm0, %v639_v1  ;;  %v567_v22 = vmax.f32 %v559_v6, 0.0  ;;  %v558_v24 = vadd.f32 %v3281_v39, %v548_v9  ;;  %v619_v26 = vmul.f32 %v3248_v17, %v3237_v12  ;;  %2449 = vmatprep.subr.mxu1 %v778_v20  ;;  %502 = vst.msk [vmem:[#allocation2 + $0xd8] sm:$0xff] %vm390_vm0, %v494_v14  ;;  %v777_v40 = vld [vmem:[#allocation2 + $0x1f0] sm:$0xff] }
  0x5b   : > { %431 = vst.msk [vmem:[#allocation2 + $0x60] sm:$0xff] %vm390_vm0, %v423_v13  ;;  %v638_v27 = vmax.f32 %v630_v16, 0.0  ;;  %v493_v28 = vmax.f32 %v485_v18, 0.0  ;;  %v403_v29 = vmul.f32 %v3260_v25, %v3237_v12  ;;  %v547_v31 = vmul.f32 %v3269_v32, %v3237_v12  ;;  %v776_v54 = vld [vmem:[#allocation2 + $0x1e8] sm:$0xff] }
  0x5c   : > { %v730_v34 = vld [vmem:[#allocation2 + $0x78] sm:$0xff]  ;;  %575 = vst.msk [vmem:[#allocation2 + $0x160] sm:$0xff] %vm390_vm0, %v567_v22  ;;  %v422_v35 = vmax.f32 %v414_v23, 0.0  ;;  %v566_v36 = vmax.f32 %v558_v24, 0.0  ;;  %v629_v37 = vadd.f32 %v3254_v21, %v619_v26  ;;  %v474_v38 = vmul.f32 %v3214_v3, %v3327_v19 }
  0x5d   : > { %2370 = vmatpush3.msra.mxu0 %v730_v34  ;;  %v729_v41 = vld [vmem:[#allocation2 + $0x70] sm:$0xff]  ;;  %646 = vst.msk [vmem:[#allocation2 + $0x1d8] sm:$0xff] %vm390_vm0, %v638_v27  ;;  %501 = vst.msk [vmem:[#allocation2 + $0xd0] sm:$0xff] %vm390_vm0, %v493_v28  ;;  %v413_v43 = vadd.f32 %v3265_v30, %v403_v29  ;;  %v557_v44 = vadd.f32 %v3281_v39, %v547_v31  ;;  %v618_v45 = vmul.f32 %v3248_v17, %v3327_v19  ;;  %v728_v48 = vld [vmem:[#allocation2 + $0x68] sm:$0xff] }
  0x5e   : > { %v402_v46 = vmul.f32 %v3260_v25, %v3327_v19  ;;  %v762_v47 = vld [vmem:[#allocation2 + $0x178] sm:$0xff]  ;;  %2371 = vmatprep.subr.mxu0 %v745_v15  ;;  %430 = vst.msk [vmem:[#allocation2 + $0x58] sm:$0xff] %vm390_vm0, %v422_v35  ;;  %574 = vst.msk [vmem:[#allocation2 + $0x158] sm:$0xff] %vm390_vm0, %v566_v36  ;;  %v637_v49 = vmax.f32 %v629_v37, 0.0  ;;  %v484_v50 = vadd.f32 %v3224_v7, %v474_v38  ;;  %v743_v55 = vld [vmem:[#allocation2 + $0xe0] sm:$0xff]  ;;  %v3390_v18 = vstv %s3311_s8 }
  0x5f   : > { %v546_v51 = vmul.f32 %v3269_v32, %v3327_v19  ;;  %v473_v52 = vmul.f32 %v3214_v3, %v3345_v33  ;;  %2450 = vmatpush3.msra.mxu1 %v762_v47  ;;  %2372 = vmatpush3.msra.mxu0 %v729_v41  ;;  %v761_v53 = vld [vmem:[#allocation2 + $0x170] sm:$0xff]  ;;  %v421_v56 = vmax.f32 %v413_v43, 0.0  ;;  %v565_v57 = vmax.f32 %v557_v44, 0.0 }
  0x60   : > { %v628_v58 = vadd.f32 %v3254_v21, %v618_v45  ;;  %v412_v59 = vadd.f32 %v3265_v30, %v402_v46  ;;  %2451 = vmatprep.subr.mxu1 %v777_v40  ;;  %2373 = vmatprep.subr.mxu0 %v744_v42  ;;  %v760_v60 = vld [vmem:[#allocation2 + $0x168] sm:$0xff]  ;;  %645 = vst.msk [vmem:[#allocation2 + $0x1d0] sm:$0xff] %vm390_vm0, %v637_v49  ;;  %v492_v61 = vmax.f32 %v484_v50, 0.0  ;;  %v3404_v15 = vstv %s3329_s10 }
  0x61   : > { %v556_v3 = vadd.f32 %v3281_v39, %v546_v51  ;;  %v483_v62 = vadd.f32 %v3224_v7, %v473_v52  ;;  %v617_v63 = vmul.f32 %v3248_v17, %v3345_v33  ;;  %2452 = vmatpush3.msra.mxu1 %v761_v53  ;;  %2374 = vmatpush3.msra.mxu0 %v728_v48  ;;  %v775_v0 = vld [vmem:[#allocation2 + $0x1e0] sm:$0xff]  ;;  %v742_v17 = vld [vmem:[#allocation2 + $0xd8] sm:$0xff]  ;;  %v3419_v37 = vstv %s3353_s12 }
  0x62   : > { %429 = vst.msk [vmem:[#allocation2 + $0x50] sm:$0xff] %vm390_vm0, %v421_v56  ;;  %573 = vst.msk [vmem:[#allocation2 + $0x150] sm:$0xff] %vm390_vm0, %v565_v57  ;;  %v636_v1 = vmax.f32 %v628_v58, 0.0  ;;  %v420_v6 = vmax.f32 %v412_v59, 0.0  ;;  %v401_v8 = vmul.f32 %v3260_v25, %v3345_v33  ;;  %v545_v9 = vmul.f32 %v3269_v32, %v3345_v33  ;;  %2453 = vmatprep.subr.mxu1 %v776_v54  ;;  %v727_v7 = vld [vmem:[#allocation2 + $0x60] sm:$0xff] }
  0x63   : > { %2375 = vmatprep.subr.mxu0 %v743_v55  ;;  %500 = vst.msk [vmem:[#allocation2 + $0xc8] sm:$0xff] %vm390_vm0, %v492_v61  ;;  %v564_v13 = vmax.f32 %v556_v3, 0.0  ;;  %v491_v14 = vmax.f32 %v483_v62, 0.0  ;;  %v627_v16 = vadd.f32 %v3254_v21, %v617_v63  ;;  %2454 = vmatpush3.msra.mxu1 %v760_v60  ;;  %v759_v25 = vld [vmem:[#allocation2 + $0x160] sm:$0xff]  ;;  %v444_v22 = vmul.f32 %v3390_v18, %v3212_v2 }
  0x64   : > { %2376 = vmatpush3.msra.mxu0 %v727_v7  ;;  %644 = vst.msk [vmem:[#allocation2 + $0x1c8] sm:$0xff] %vm390_vm0, %v636_v1  ;;  %428 = vst.msk [vmem:[#allocation2 + $0x48] sm:$0xff] %vm390_vm0, %v420_v6  ;;  %v411_v32 = vadd.f32 %v3265_v30, %v401_v8  ;;  %v555_v20 = vadd.f32 %v3281_v39, %v545_v9  ;;  %v3399_v21 = vstv %s3320_s9  ;;  %2455 = vmatprep.subr.mxu1 %v775_v0  ;;  %v774_v23 = vld [vmem:[#allocation2 + $0x1d8] sm:$0xff]  ;;  %v741_v24 = vld [vmem:[#allocation2 + $0xd0] sm:$0xff] }
  0x65   : > { %2377 = vmatprep.subr.mxu0 %v742_v17  ;;  %572 = vst.msk [vmem:[#allocation2 + $0x148] sm:$0xff] %vm390_vm0, %v564_v13  ;;  %499 = vst.msk [vmem:[#allocation2 + $0xc0] sm:$0xff] %vm390_vm0, %v491_v14  ;;  %v635_v26 = vmax.f32 %v627_v16, 0.0  ;;  %v3407_v30 = vstv %s3336_s29  ;;  %v3410_v39 = vstv %s3347_s11  ;;  %2456 = vmatpush3.msra.mxu1 %v759_v25  ;;  %v726_v27 = vld [vmem:[#allocation2 + $0x58] sm:$0xff]  ;;  %v454_v34 = vadd.f32 %v3399_v21, %v444_v22  ;;  %s2888_s29 = smul.u32 24, %s4291_s24 }
  0x66   : > { %v758_v28 = vld [vmem:[#allocation2 + $0x158] sm:$0xff]  ;;  %v419_v29 = vmax.f32 %v411_v32, 0.0  ;;  %v563_v31 = vmax.f32 %v555_v20, 0.0  ;;  %v588_v35 = vmul.f32 %v3404_v15, %v3212_v2  ;;  %2457 = vmatprep.subr.mxu1 %v774_v23  ;;  %2378 = vmatpush3.msra.mxu0 %v726_v27  ;;  %v371_v36 = vmul.f32 %v3410_v39, %v3212_v2 }
  0x67   : > { %643 = vst.msk [vmem:[#allocation2 + $0x1c0] sm:$0xff] %vm390_vm0, %v635_v26  ;;  %v3422_v38 = vstv %s3363_s13  ;;  %v3425_v40 = vstv %s3372_s14  ;;  %2458 = vmatpush3.msra.mxu1 %v758_v28  ;;  %2379 = vmatprep.subr.mxu0 %v741_v24  ;;  %v773_v41 = vld [vmem:[#allocation2 + $0x1d0] sm:$0xff]  ;;  %v462_v42 = vmax.f32 %v454_v34, 0.0  ;;  %v443_v45 = vmul.f32 %v3390_v18, %v3217_v4  ;;  %s353_s13 = scalar_lea.vmem %s4260_s7, %s2888_s29 }
  0x68   : > { %427 = vst.msk [vmem:[#allocation2 + $0x40] sm:$0xff] %vm390_vm0, %v419_v29  ;;  %571 = vst.msk [vmem:[#allocation2 + $0x140] sm:$0xff] %vm390_vm0, %v563_v31  ;;  %v598_v43 = vadd.f32 %v3407_v30, %v588_v35  ;;  %v516_v44 = vmul.f32 %v3422_v38, %v3212_v2  ;;  %2459 = vmatprep.subr.mxu1 %v773_v41  ;;  %v381_v48 = vadd.f32 %v3419_v37, %v371_v36 }
  0x69   : > { %v725_v46 = vld [vmem:[#allocation2 + $0x50] sm:$0xff]  ;;  %v587_v49 = vmul.f32 %v3404_v15, %v3217_v4  ;;  %v370_v50 = vmul.f32 %v3410_v39, %v3217_v4  ;;  %v515_v51 = vmul.f32 %v3422_v38, %v3217_v4  ;;  %470 = vst.msk [vmem:[#allocation2 + $0xb8] sm:$0xff] %vm390_vm0, %v462_v42  ;;  %v453_v54 = vadd.f32 %v3399_v21, %v443_v45 }
  0x6a   : > { %v757_v47 = vld [vmem:[#allocation2 + $0x150] sm:$0xff]  ;;  %2380 = vmatpush3.msra.mxu0 %v725_v46  ;;  %v740_v2 = vld [vmem:[#allocation2 + $0xc8] sm:$0xff]  ;;  %v606_v52 = vmax.f32 %v598_v43, 0.0  ;;  %v526_v53 = vadd.f32 %v3425_v40, %v516_v44  ;;  %v442_v55 = vmul.f32 %v3390_v18, %v3220_v5  ;;  %v389_v58 = vmax.f32 %v381_v48, 0.0 }
  0x6b   : > { %2460 = vmatpush3.msra.mxu1 %v757_v47  ;;  %2381 = vmatprep.subr.mxu0 %v740_v2  ;;  %v772_v56 = vld [vmem:[#allocation2 + $0x1c8] sm:$0xff]  ;;  %v597_v59 = vadd.f32 %v3407_v30, %v587_v49  ;;  %v380_v4 = vadd.f32 %v3419_v37, %v370_v50  ;;  %v525_v60 = vadd.f32 %v3425_v40, %v515_v51  ;;  %v461_v63 = vmax.f32 %v453_v54, 0.0 }
  0x6c   : > { %v724_v57 = vld [vmem:[#allocation2 + $0x48] sm:$0xff]  ;;  %2461 = vmatprep.subr.mxu1 %v772_v56  ;;  %v739_v3 = vld [vmem:[#allocation2 + $0xc0] sm:$0xff]  ;;  %614 = vst.msk [vmem:[#allocation2 + $0x1b8] sm:$0xff] %vm390_vm0, %v606_v52  ;;  %v534_v62 = vmax.f32 %v526_v53, 0.0  ;;  %v452_v0 = vadd.f32 %v3399_v21, %v442_v55  ;;  %v586_v1 = vmul.f32 %v3404_v15, %v3220_v5  ;;  %398 = vst.msk [vmem:[#allocation2 + $0x38] sm:$0xff] %vm390_vm0, %v389_v58 }
  0x6d   : > { %2382 = vmatpush3.msra.mxu0 %v724_v57  ;;  %v756_v61 = vld [vmem:[#allocation2 + $0x148] sm:$0xff]  ;;  %v605_v6 = vmax.f32 %v597_v59, 0.0  ;;  %v388_v8 = vmax.f32 %v380_v4, 0.0  ;;  %v533_v9 = vmax.f32 %v525_v60, 0.0  ;;  %v369_v7 = vmul.f32 %v3410_v39, %v3220_v5  ;;  %469 = vst.msk [vmem:[#allocation2 + $0xb0] sm:$0xff] %vm390_vm0, %v461_v63 }
  0x6e   : > { %2462 = vmatpush3.msra.mxu1 %v756_v61  ;;  %2383 = vmatprep.subr.mxu0 %v739_v3  ;;  %v771_v17 = vld [vmem:[#allocation2 + $0x1c0] sm:$0xff]  ;;  %542 = vst.msk [vmem:[#allocation2 + $0x138] sm:$0xff] %vm390_vm0, %v534_v62  ;;  %v460_v13 = vmax.f32 %v452_v0, 0.0  ;;  %v596_v14 = vadd.f32 %v3407_v30, %v586_v1  ;;  %v514_v16 = vmul.f32 %v3422_v38, %v3220_v5 }
  0x6f   : > { %v441_v25 = vmul.f32 %v3390_v18, %v3231_v10  ;;  %2463 = vmatprep.subr.mxu1 %v771_v17  ;;  %v723_v32 = vld [vmem:[#allocation2 + $0x40] sm:$0xff]  ;;  %613 = vst.msk [vmem:[#allocation2 + $0x1b0] sm:$0xff] %vm390_vm0, %v605_v6  ;;  %397 = vst.msk [vmem:[#allocation2 + $0x30] sm:$0xff] %vm390_vm0, %v388_v8  ;;  %v379_v22 = vadd.f32 %v3419_v37, %v369_v7  ;;  %v585_v23 = vmul.f32 %v3404_v15, %v3231_v10 }
  0x70   : > { %v755_v20 = vld [vmem:[#allocation2 + $0x140] sm:$0xff]  ;;  %541 = vst.msk [vmem:[#allocation2 + $0x130] sm:$0xff] %vm390_vm0, %v533_v9  ;;  %v368_v5 = vmul.f32 %v3410_v39, %v3231_v10  ;;  %v513_v24 = vmul.f32 %v3422_v38, %v3231_v10  ;;  %2384 = vmatpush3.msra.mxu0 %v723_v32  ;;  %468 = vst.msk [vmem:[#allocation2 + $0xa8] sm:$0xff] %vm390_vm0, %v460_v13  ;;  %v604_v26 = vmax.f32 %v596_v14, 0.0  ;;  %v738_v31 = vld [vmem:[#allocation2 + $0xb8] sm:$0xff] }
  0x71   : > { %2464 = vmatpush3.msra.mxu1 %v755_v20  ;;  %v524_v27 = vadd.f32 %v3425_v40, %v514_v16  ;;  %v451_v28 = vadd.f32 %v3399_v21, %v441_v25  ;;  %v440_v29 = vmul.f32 %v3390_v18, %v3234_v11  ;;  %v387_v34 = vmax.f32 %v379_v22, 0.0  ;;  %2385 = vmatprep.subr.mxu0 %v738_v31 }
  0x72   : > { %v595_v35 = vadd.f32 %v3407_v30, %v585_v23  ;;  %v378_v36 = vadd.f32 %v3419_v37, %v368_v5  ;;  %v523_v10 = vadd.f32 %v3425_v40, %v513_v24  ;;  %612 = vst.msk [vmem:[#allocation2 + $0x1a8] sm:$0xff] %vm390_vm0, %v604_v26  ;;  %v584_v44 = vmul.f32 %v3404_v15, %v3234_v11 }
  0x73   : > { %v532_v41 = vmax.f32 %v524_v27, 0.0  ;;  %v459_v42 = vmax.f32 %v451_v28, 0.0  ;;  %v450_v43 = vadd.f32 %v3399_v21, %v440_v29  ;;  %v770_v45 = vld [vmem:[#allocation2 + $0x1b8] sm:$0xff]  ;;  %396 = vst.msk [vmem:[#allocation2 + $0x28] sm:$0xff] %vm390_vm0, %v387_v34  ;;  %v367_v49 = vmul.f32 %v3410_v39, %v3234_v11 }
  0x74   : > { %v603_v46 = vmax.f32 %v595_v35, 0.0  ;;  %v386_v47 = vmax.f32 %v378_v36, 0.0  ;;  %v531_v48 = vmax.f32 %v523_v10, 0.0  ;;  %2465 = vmatprep.subr.mxu1 %v770_v45  ;;  %v722_v50 = vld [vmem:[#allocation2 + $0x38] sm:$0xff]  ;;  %v594_v2 = vadd.f32 %v3407_v30, %v584_v44  ;;  %v737_v55 = vld [vmem:[#allocation2 + $0xb0] sm:$0xff] }
  0x75   : > { %540 = vst.msk [vmem:[#allocation2 + $0x128] sm:$0xff] %vm390_vm0, %v532_v41  ;;  %467 = vst.msk [vmem:[#allocation2 + $0xa0] sm:$0xff] %vm390_vm0, %v459_v42  ;;  %v458_v51 = vmax.f32 %v450_v43, 0.0  ;;  %v512_v52 = vmul.f32 %v3422_v38, %v3234_v11  ;;  %v439_v53 = vmul.f32 %v3390_v18, %v3237_v12  ;;  %2386 = vmatpush3.msra.mxu0 %v722_v50  ;;  %v754_v54 = vld [vmem:[#allocation2 + $0x138] sm:$0xff] }
  0x76   : > { %611 = vst.msk [vmem:[#allocation2 + $0x1a0] sm:$0xff] %vm390_vm0, %v603_v46  ;;  %395 = vst.msk [vmem:[#allocation2 + $0x20] sm:$0xff] %vm390_vm0, %v386_v47  ;;  %v377_v56 = vadd.f32 %v3419_v37, %v367_v49  ;;  %v583_v57 = vmul.f32 %v3404_v15, %v3237_v12  ;;  %v366_v11 = vmul.f32 %v3410_v39, %v3237_v12  ;;  %2466 = vmatpush3.msra.mxu1 %v754_v54  ;;  %v769_v59 = vld [vmem:[#allocation2 + $0x1b0] sm:$0xff]  ;;  %v651_v54 = vld [vmem:[%s4255_s2] sm:$0xff] }
  0x77   : > { %539 = vst.msk [vmem:[#allocation2 + $0x120] sm:$0xff] %vm390_vm0, %v531_v48  ;;  %v511_v58 = vmul.f32 %v3422_v38, %v3237_v12  ;;  %2387 = vmatprep.subr.mxu0 %v737_v55  ;;  %v721_v4 = vld [vmem:[#allocation2 + $0x30] sm:$0xff]  ;;  %466 = vst.msk [vmem:[#allocation2 + $0x98] sm:$0xff] %vm390_vm0, %v458_v51  ;;  %v602_v61 = vmax.f32 %v594_v2, 0.0  ;;  %v522_v3 = vadd.f32 %v3425_v40, %v512_v52  ;;  %2467 = vmatprep.subr.mxu1 %v769_v59  ;;  %v736_v0 = vld [vmem:[#allocation2 + $0xa8] sm:$0xff] }
  0x78   : > { %v753_v60 = vld [vmem:[#allocation2 + $0x130] sm:$0xff]  ;;  %v449_v62 = vadd.f32 %v3399_v21, %v439_v53  ;;  %v438_v63 = vmul.f32 %v3390_v18, %v3327_v19  ;;  %2388 = vmatpush3.msra.mxu0 %v721_v4  ;;  %v385_v1 = vmax.f32 %v377_v56, 0.0  ;;  %v593_v12 = vadd.f32 %v3407_v30, %v583_v57 }
  0x79   : > { %v376_v6 = vadd.f32 %v3419_v37, %v366_v11  ;;  %v521_v8 = vadd.f32 %v3425_v40, %v511_v58  ;;  %2468 = vmatpush3.msra.mxu1 %v753_v60  ;;  %2389 = vmatprep.subr.mxu0 %v736_v0  ;;  %610 = vst.msk [vmem:[#allocation2 + $0x198] sm:$0xff] %vm390_vm0, %v602_v61  ;;  %v530_v9 = vmax.f32 %v522_v3, 0.0  ;;  %v768_v14 = vld [vmem:[#allocation2 + $0x1a8] sm:$0xff]  ;;  %v653_v55 = vld [vmem:[%s4255_s2 + $0x10] sm:$0xff]  ;;  %v658_v60 = vld [vmem:[%s4255_s2 + $0x38] sm:$0xff] }
  0x7a   : > { %v457_v7 = vmax.f32 %v449_v62, 0.0  ;;  %v448_v17 = vadd.f32 %v3399_v21, %v438_v63  ;;  %v582_v13 = vmul.f32 %v3404_v15, %v3327_v19  ;;  %394 = vst.msk [vmem:[#allocation2 + $0x18] sm:$0xff] %vm390_vm0, %v385_v1  ;;  %v601_v16 = vmax.f32 %v593_v12, 0.0  ;;  %2469 = vmatprep.subr.mxu1 %v768_v14  ;;  %v720_v22 = vld [vmem:[#allocation2 + $0x28] sm:$0xff]  ;;  %v655_v61 = vld [vmem:[%s4255_s2 + $0x20] sm:$0xff]  ;;  %v657_v3 = vld [vmem:[%s4255_s2 + $0x30] sm:$0xff] }
  0x7b   : > { %v384_v25 = vmax.f32 %v376_v6, 0.0  ;;  %v529_v32 = vmax.f32 %v521_v8, 0.0  ;;  %v365_v20 = vmul.f32 %v3410_v39, %v3327_v19  ;;  %538 = vst.msk [vmem:[#allocation2 + $0x118] sm:$0xff] %vm390_vm0, %v530_v9  ;;  %v510_v24 = vmul.f32 %v3422_v38, %v3327_v19  ;;  %2390 = vmatpush3.msra.mxu0 %v720_v22  ;;  %v656_v11 = vld [vmem:[%s4255_s2 + $0x28] sm:$0xff]  ;;  %v662_v63 = vld [vmem:[%s4255_s2 + $0x58] sm:$0xff]  ;;  %v659_v0 = vld [vmem:[%s4255_s2 + $0x40] sm:$0xff] }
  0x7c   : > { %465 = vst.msk [vmem:[#allocation2 + $0x90] sm:$0xff] %vm390_vm0, %v457_v7  ;;  %v456_v23 = vmax.f32 %v448_v17, 0.0  ;;  %v592_v5 = vadd.f32 %v3407_v30, %v582_v13  ;;  %v437_v26 = vmul.f32 %v3390_v18, %v3345_v33  ;;  %v752_v27 = vld [vmem:[#allocation2 + $0x128] sm:$0xff]  ;;  %v735_v28 = vld [vmem:[#allocation2 + $0xa0] sm:$0xff]  ;;  %609 = vst.msk [vmem:[#allocation2 + $0x190] sm:$0xff] %vm390_vm0, %v601_v16  ;;  %v581_v31 = vmul.f32 %v3404_v15, %v3345_v33 }
  0x7d   : > { %393 = vst.msk [vmem:[#allocation2 + $0x10] sm:$0xff] %vm390_vm0, %v384_v25  ;;  %537 = vst.msk [vmem:[#allocation2 + $0x110] sm:$0xff] %vm390_vm0, %v529_v32  ;;  %v375_v29 = vadd.f32 %v3419_v37, %v365_v20  ;;  %v364_v19 = vmul.f32 %v3410_v39, %v3345_v33  ;;  %v509_v18 = vmul.f32 %v3422_v38, %v3345_v33  ;;  %2470 = vmatpush3.msra.mxu1 %v752_v27  ;;  %v767_v34 = vld [vmem:[#allocation2 + $0x1a0] sm:$0xff]  ;;  %v660_v62 = vld [vmem:[%s4255_s2 + $0x48] sm:$0xff] }
  0x7e   : > { %2391 = vmatprep.subr.mxu0 %v735_v28  ;;  %v719_v35 = vld [vmem:[#allocation2 + $0x20] sm:$0xff]  ;;  %464 = vst.msk [vmem:[#allocation2 + $0x88] sm:$0xff] %vm390_vm0, %v456_v23  ;;  %v600_v10 = vmax.f32 %v592_v5, 0.0  ;;  %v520_v41 = vadd.f32 %v3425_v40, %v510_v24  ;;  %v447_v42 = vadd.f32 %v3399_v21, %v437_v26  ;;  %2471 = vmatprep.subr.mxu1 %v767_v34  ;;  %v734_v15 = vld [vmem:[#allocation2 + $0x98] sm:$0xff]  ;;  %v661_v1 = vld [vmem:[%s4255_s2 + $0x50] sm:$0xff] }
  0x7f   : > { %v751_v36 = vld [vmem:[#allocation2 + $0x120] sm:$0xff]  ;;  %2392 = vmatpush3.msra.mxu0 %v719_v35  ;;  %v383_v43 = vmax.f32 %v375_v29, 0.0  ;;  %v591_v39 = vadd.f32 %v3407_v30, %v581_v31  ;;  %v374_v33 = vadd.f32 %v3419_v37, %v364_v19  ;;  %v519_v38 = vadd.f32 %v3425_v40, %v509_v18  ;;  %v664_v12 = vld [vmem:[%s4255_s2 + $0x68] sm:$0xff]  ;;  %v666_v6 = vld [vmem:[%s4255_s2 + $0x78] sm:$0xff] }
  0x80   : > { %2472 = vmatpush3.msra.mxu1 %v751_v36  ;;  %2393 = vmatprep.subr.mxu0 %v734_v15  ;;  %608 = vst.msk [vmem:[#allocation2 + $0x188] sm:$0xff] %vm390_vm0, %v600_v10  ;;  %v528_v44 = vmax.f32 %v520_v41, 0.0  ;;  %v455_v45 = vmax.f32 %v447_v42, 0.0  ;;  %v766_v46 = vld [vmem:[#allocation2 + $0x198] sm:$0xff]  ;;  %v663_v8 = vld [vmem:[%s4255_s2 + $0x60] sm:$0xff]  ;;  %v665_v9 = vld [vmem:[%s4255_s2 + $0x70] sm:$0xff] }
  0x81   : > { %392 = vst.msk [vmem:[#allocation2 + $0x8] sm:$0xff] %vm390_vm0, %v383_v43  ;;  %v599_v21 = vmax.f32 %v591_v39, 0.0  ;;  %v382_v47 = vmax.f32 %v374_v33, 0.0  ;;  %v527_v48 = vmax.f32 %v519_v38, 0.0  ;;  %2473 = vmatprep.subr.mxu1 %v766_v46  ;;  %v718_v49 = vld [vmem:[#allocation2 + $0x18] sm:$0xff]  ;;  %v668_v7 = vld [vmem:[%s4255_s2 + $0x88] sm:$0xff] }
  0x82   : > { %536 = vst.msk [vmem:[#allocation2 + $0x108] sm:$0xff] %vm390_vm0, %v528_v44  ;;  %463 = vst.msk [vmem:[#allocation2 + $0x80] sm:$0xff] %vm390_vm0, %v455_v45  ;;  %2394 = vmatpush3.msra.mxu0 %v718_v49  ;;  %v750_v30 = vld [vmem:[#allocation2 + $0x118] sm:$0xff]  ;;  %v667_v13 = vld [vmem:[%s4255_s2 + $0x80] sm:$0xff] }
  0x83   : > { %v733_v37 = vld [vmem:[#allocation2 + $0x90] sm:$0xff]  ;;  %607 = vst.msk [vmem:[#allocation2 + $0x180] sm:$0xff] %vm390_vm0, %v599_v21  ;;  %391 = vst.msk [vmem:[#allocation2] sm:$0xff] %vm390_vm0, %v382_v47  ;;  %2474 = vmatpush3.msra.mxu1 %v750_v30  ;;  %v670_v17 = vld [vmem:[%s4255_s2 + $0x98] sm:$0xff] }
  0x84   : > { %535 = vst.msk [vmem:[#allocation2 + $0x100] sm:$0xff] %vm390_vm0, %v527_v48  ;;  %2395 = vmatprep.subr.mxu0 %v733_v37  ;;  %v765_v40 = vld [vmem:[#allocation2 + $0x190] sm:$0xff]  ;;  %v672_v16 = vld [vmem:[%s4255_s2 + $0xa8] sm:$0xff]  ;;  %v674_v25 = vld [vmem:[%s4255_s2 + $0xb8] sm:$0xff] }
  0x85   : > { %v717_v50 = vld [vmem:[#allocation2 + $0x10] sm:$0xff]  ;;  %2475 = vmatprep.subr.mxu1 %v765_v40  ;;  %v732_v2 = vld [vmem:[#allocation2 + $0x88] sm:$0xff]  ;;  %v671_v32 = vld [vmem:[%s4255_s2 + $0xa0] sm:$0xff] }
  0x86   : > { %v749_v51 = vld [vmem:[#allocation2 + $0x110] sm:$0xff]  ;;  %2396 = vmatpush3.msra.mxu0 %v717_v50  ;;  %v676_v22 = vld [vmem:[%s4255_s2 + $0xc8] sm:$0xff]  ;;  %v678_v23 = vld [vmem:[%s4255_s2 + $0xd8] sm:$0xff] }
  0x87   : > { %2476 = vmatpush3.msra.mxu1 %v749_v51  ;;  %2397 = vmatprep.subr.mxu0 %v732_v2  ;;  %v764_v52 = vld [vmem:[#allocation2 + $0x188] sm:$0xff]  ;;  %v669_v14 = vld [vmem:[%s4255_s2 + $0x90] sm:$0xff]  ;;  %v675_v5 = vld [vmem:[%s4255_s2 + $0xc0] sm:$0xff] }
  0x88   : > { %2477 = vmatprep.subr.mxu1 %v764_v52  ;;  %v716_v53 = vld [vmem:[#allocation2 + $0x8] sm:$0xff]  ;;  %v673_v20 = vld [vmem:[%s4255_s2 + $0xb0] sm:$0xff]  ;;  %v682_v27 = vld [vmem:[%s4255_s2 + $0xf8] sm:$0xff] }
  0x89   : > { %2398 = vmatpush3.msra.mxu0 %v716_v53  ;;  %v748_v56 = vld [vmem:[#allocation2 + $0x108] sm:$0xff]  ;;  %v731_v57 = vld [vmem:[#allocation2 + $0x80] sm:$0xff]  ;;  %v677_v24 = vld [vmem:[%s4255_s2 + $0xd0] sm:$0xff] }
  0x8a   : > { %2478 = vmatpush3.msra.mxu1 %v748_v56  ;;  %2399 = vmatprep.subr.mxu0 %v731_v57  ;;  %v763_v58 = vld [vmem:[#allocation2 + $0x180] sm:$0xff]  ;;  %v680_v26 = vld [vmem:[%s4255_s2 + $0xe8] sm:$0xff]  ;;  %v681_v29 = vld [vmem:[%s4255_s2 + $0xf0] sm:$0xff]  ;;  %v3075_v57 = vmov 0  }
  0x8b   : > { %v715_v59 = vld [vmem:[#allocation2] sm:$0xff]  ;;  %2479 = vmatprep.subr.mxu1 %v763_v58  ;;  %v684_v31 = vld [vmem:[%s4255_s2 + $0x108] sm:$0xff]  ;;  %v686_v19 = vld [vmem:[%s4255_s2 + $0x118] sm:$0xff]  ;;  %2951 = vset.pattern.permute.xlu0 %v3075_v57 }
  0x8c   : > { %v747_v4 = vld [vmem:[#allocation2 + $0x100] sm:$0xff]  ;;  %2400 = vmatpush3.msra.mxu0 %v715_v59  ;;  %v685_v34 = vld [vmem:[%s4255_s2 + $0x110] sm:$0xff]  ;;  %v688_v35 = vld [vmem:[%s4255_s2 + $0x128] sm:$0xff]  ;;  %2952 = vset.pattern.permute.xlu1 %v3075_v57 }
  0x8d   : > { %2480 = vmatpush3.msra.mxu1 %v747_v4  ;;  %844 = vmatmul.mubr.f32.vlgmr.msra.gmra.mxu0 %v651_v54  ;;  %v679_v28 = vld [vmem:[%s4255_s2 + $0xe0] sm:$0xff]  ;;  %v690_v36 = vld [vmem:[%s4255_s2 + $0x138] sm:$0xff]  ;;  %v689_v41 = vld [vmem:[%s4255_s2 + $0x130] sm:$0xff] }
  0x8e   : > { %989 = vmatmul.mubr.f32.vlgmr.msra.gmra.mxu1 %v653_v55  ;;  %848 = vmatprep.mubr.f32.mxu0 %v656_v11  ;;  %v683_v18 = vld [vmem:[%s4255_s2 + $0x100] sm:$0xff]  ;;  %v692_v42 = vld [vmem:[%s4255_s2 + $0x148] sm:$0xff]  ;;  %v694_v15 = vld [vmem:[%s4255_s2 + $0x158] sm:$0xff] }
  0x8f   : > { %993 = vmatprep.mubr.f32.mxu1 %v658_v60  ;;  %v687_v10 = vld [vmem:[%s4255_s2 + $0x120] sm:$0xff]  ;;  %v693_v39 = vld [vmem:[%s4255_s2 + $0x150] sm:$0xff]  ;;  %v696_v33 = vld [vmem:[%s4255_s2 + $0x168] sm:$0xff] }
  0x90   : > { %v691_v43 = vld [vmem:[%s4255_s2 + $0x140] sm:$0xff]  ;;  %v698_v38 = vld [vmem:[%s4255_s2 + $0x178] sm:$0xff]  ;;  %v697_v45 = vld [vmem:[%s4255_s2 + $0x170] sm:$0xff] }
  0x91   : > { %849 = vmatmul.mubr.f32.gmra.mxu0 %v655_v61  ;;  %v695_v44 = vld [vmem:[%s4255_s2 + $0x160] sm:$0xff]  ;;  %v700_v46 = vld [vmem:[%s4255_s2 + $0x188] sm:$0xff]  ;;  %v702_v21 = vld [vmem:[%s4255_s2 + $0x198] sm:$0xff] }
  0x92   : > { %994 = vmatmul.mubr.f32.gmra.mxu1 %v657_v3  ;;  %853 = vmatprep.mubr.f32.mxu0 %v660_v62  ;;  %v699_v47 = vld [vmem:[%s4255_s2 + $0x180] sm:$0xff]  ;;  %v701_v48 = vld [vmem:[%s4255_s2 + $0x190] sm:$0xff]  ;;  %v704_v49 = vld [vmem:[%s4255_s2 + $0x1a8] sm:$0xff] }
  0x93   : > { %998 = vmatprep.mubr.f32.mxu1 %v662_v63  ;;  %v706_v30 = vld [vmem:[%s4255_s2 + $0x1b8] sm:$0xff]  ;;  %v703_v37 = vld [vmem:[%s4255_s2 + $0x1a0] sm:$0xff]  ;;  %v705_v40 = vld [vmem:[%s4255_s2 + $0x1b0] sm:$0xff] }
  0x94   : > { %v708_v50 = vld [vmem:[%s4255_s2 + $0x1c8] sm:$0xff]  ;;  %v710_v51 = vld [vmem:[%s4255_s2 + $0x1d8] sm:$0xff]  ;;  %v707_v2 = vld [vmem:[%s4255_s2 + $0x1c0] sm:$0xff] }
  0x95   : > { %854 = vmatmul.mubr.f32.gmra.mxu0 %v659_v0  ;;  %v709_v52 = vld [vmem:[%s4255_s2 + $0x1d0] sm:$0xff]  ;;  %v712_v53 = vld [vmem:[%s4255_s2 + $0x1e8] sm:$0xff]  ;;  %v714_v54 = vld [vmem:[%s4255_s2 + $0x1f8] sm:$0xff] }
  0x96   : > { %999 = vmatmul.mubr.f32.gmra.mxu1 %v661_v1  ;;  %858 = vmatprep.mubr.f32.mxu0 %v664_v12  ;;  %v711_v55 = vld [vmem:[%s4255_s2 + $0x1e0] sm:$0xff]  ;;  %v713_v56 = vld [vmem:[%s4255_s2 + $0x1f0] sm:$0xff]  ;;  %v1142_v11 = vld [vmem:[%s4259_s6 + $0xf8] sm:$0xff] }
  0x97   : > { %1003 = vmatprep.mubr.f32.mxu1 %v666_v6  ;;  %1310 = vperm.xlu0 %2951, %v1142_v11   ;;  %v1141_v58 = vld [vmem:[%s4259_s6 + $0xf0] sm:$0xff]  ;;  %v1126_v59 = vld [vmem:[%s4259_s6 + $0x78] sm:$0xff]  ;;  %v1140_v60 = vld [vmem:[%s4259_s6 + $0xe8] sm:$0xff] }
  0x98   : > { %1305 = vperm.xlu1 %2952, %v1141_v58   ;;  %v1125_v4 = vld [vmem:[%s4259_s6 + $0x70] sm:$0xff]  ;;  %v1069_v61 = vld [vmem:[#allocation6] sm:$0xff]  ;;  %v1124_v3 = vld [vmem:[%s4259_s6 + $0x68] sm:$0xff] }
  0x99   : > { %859 = vmatmul.mubr.f32.gmra.mxu0 %v663_v8  ;;  %v1139_v62 = vld [vmem:[%s4259_s6 + $0xe0] sm:$0xff]  ;;  %v1138_v0 = vld [vmem:[%s4259_s6 + $0xd8] sm:$0xff]  ;;  %v1137_v12 = vld [vmem:[%s4259_s6 + $0xd0] sm:$0xff] }
  0x9a   : > { %1004 = vmatmul.mubr.f32.gmra.mxu1 %v665_v9  ;;  %863 = vmatprep.mubr.f32.mxu0 %v668_v7  ;;  %v1123_v63 = vld [vmem:[%s4259_s6 + $0x60] sm:$0xff]  ;;  %v1122_v1 = vld [vmem:[%s4259_s6 + $0x58] sm:$0xff]  ;;  %v1121_v6 = vld [vmem:[%s4259_s6 + $0x50] sm:$0xff] }
  0x9b   : > { %1008 = vmatprep.mubr.f32.mxu1 %v670_v17  ;;  %1230 = vperm.xlu0 %2951, %v1126_v59   ;;  %v1136_v8 = vld [vmem:[%s4259_s6 + $0xc8] sm:$0xff]  ;;  %v1135_v7 = vld [vmem:[%s4259_s6 + $0xc0] sm:$0xff] }
  0x9c   : > { %1225 = vperm.xlu1 %2952, %v1125_v4   ;;  %v1120_v9 = vld [vmem:[%s4259_s6 + $0x48] sm:$0xff]  ;;  %v1119_v17 = vld [vmem:[%s4259_s6 + $0x40] sm:$0xff] }
  0x9d   : > { %864 = vmatmul.mubr.f32.gmra.mxu0 %v667_v13  ;;  %v1134_v13 = vld [vmem:[%s4259_s6 + $0xb8] sm:$0xff]  ;;  %v1127_v59 = vld [vmem:[%s4259_s6 + $0x80] sm:$0xff] }
  0x9e   : > { %1009 = vmatmul.mubr.f32.gmra.mxu1 %v669_v14  ;;  %868 = vmatprep.mubr.f32.mxu0 %v672_v16  ;;  %v1118_v14 = vld [vmem:[%s4259_s6 + $0x38] sm:$0xff]  ;;  %v1133_v16 = vld [vmem:[%s4259_s6 + $0xb0] sm:$0xff] }
  0x9f   : > { %1013 = vmatprep.mubr.f32.mxu1 %v674_v25  ;;  %1300 = vperm.xlu0 %2951, %v1140_v60   ;;  %v1117_v25 = vld [vmem:[%s4259_s6 + $0x30] sm:$0xff]  ;;  %v1111_v60 = vld [vmem:[%s4259_s6] sm:$0xff] }
  0xa0   : > { %1220 = vperm.xlu1 %2952, %v1124_v3  }
  0xa1   : > { %869 = vmatmul.mubr.f32.gmra.mxu0 %v671_v32 }
  0xa2   : > { %1014 = vmatmul.mubr.f32.gmra.mxu1 %v673_v20  ;;  %873 = vmatprep.mubr.f32.mxu0 %v676_v22  ;;  %v1132_v20 = vld [vmem:[%s4259_s6 + $0xa8] sm:$0xff] }
  0xa3   : > { %1018 = vmatprep.mubr.f32.mxu1 %v678_v23  ;;  %1295 = vperm.xlu0 %2951, %v1139_v62   ;;  %v1116_v23 = vld [vmem:[%s4259_s6 + $0x28] sm:$0xff] }
  0xa4   : > { %1215 = vperm.xlu1 %2952, %v1123_v63  }
  0xa5   : > { %874 = vmatmul.mubr.f32.gmra.mxu0 %v675_v5 }
  0xa6   : > { %1019 = vmatmul.mubr.f32.gmra.mxu1 %v677_v24  ;;  %878 = vmatprep.mubr.f32.mxu0 %v680_v26 }
  0xa7   : > { %1023 = vmatprep.mubr.f32.mxu1 %v682_v27  ;;  %1290 = vperm.xlu0 %2951, %v1138_v0   ;;  %v1152_v0 = vld [vmem:[%s4259_s6 + $0x148] sm:$0xff] }
  0xa8   : > { %1210 = vperm.xlu1 %2952, %v1122_v1  }
  0xa9   : > { %879 = vmatmul.mubr.f32.gmra.mxu0 %v679_v28 }
  0xaa   : > { %1024 = vmatmul.mubr.f32.gmra.mxu1 %v681_v29  ;;  %883 = vmatprep.mubr.f32.mxu0 %v684_v31  ;;  %v1131_v29 = vld [vmem:[%s4259_s6 + $0xa0] sm:$0xff] }
  0xab   : > { %1028 = vmatprep.mubr.f32.mxu1 %v686_v19  ;;  %1285 = vperm.xlu0 %2951, %v1137_v12   ;;  %v1115_v19 = vld [vmem:[%s4259_s6 + $0x20] sm:$0xff] }
  0xac   : > { %1205 = vperm.xlu1 %2952, %v1121_v6   ;;  %v1151_v12 = vld [vmem:[%s4259_s6 + $0x140] sm:$0xff] }
  0xad   : > { %884 = vmatmul.mubr.f32.gmra.mxu0 %v683_v18 }
  0xae   : > { %1029 = vmatmul.mubr.f32.gmra.mxu1 %v685_v34  ;;  %888 = vmatprep.mubr.f32.mxu0 %v688_v35 }
  0xaf   : > { %1033 = vmatprep.mubr.f32.mxu1 %v690_v36  ;;  %1280 = vperm.xlu0 %2951, %v1136_v8  }
  0xb0   : > { %1200 = vperm.xlu1 %2952, %v1120_v9  }
  0xb1   : > { %889 = vmatmul.mubr.f32.gmra.mxu0 %v687_v10 }
  0xb2   : > { %1034 = vmatmul.mubr.f32.gmra.mxu1 %v689_v41  ;;  %893 = vmatprep.mubr.f32.mxu0 %v692_v42  ;;  %v1130_v42 = vld [vmem:[%s4259_s6 + $0x98] sm:$0xff] }
  0xb3   : > { %1038 = vmatprep.mubr.f32.mxu1 %v694_v15  ;;  %1275 = vperm.xlu0 %2951, %v1135_v7   ;;  %v1150_v7 = vld [vmem:[%s4259_s6 + $0x138] sm:$0xff] }
  0xb4   : > { %1195 = vperm.xlu1 %2952, %v1119_v17  }
  0xb5   : > { %894 = vmatmul.mubr.f32.gmra.mxu0 %v691_v43  ;;  %v1114_v43 = vld [vmem:[%s4259_s6 + $0x18] sm:$0xff] }
  0xb6   : > { %1039 = vmatmul.mubr.f32.gmra.mxu1 %v693_v39  ;;  %898 = vmatprep.mubr.f32.mxu0 %v696_v33 }
  0xb7   : > { %1043 = vmatprep.mubr.f32.mxu1 %v698_v38  ;;  %1270 = vperm.xlu0 %2951, %v1134_v13   ;;  %v1149_v13 = vld [vmem:[%s4259_s6 + $0x130] sm:$0xff] }
  0xb8   : > { %1190 = vperm.xlu1 %2952, %v1118_v14  }
  0xb9   : > { %899 = vmatmul.mubr.f32.gmra.mxu0 %v695_v44 }
  0xba   : > { %1044 = vmatmul.mubr.f32.gmra.mxu1 %v697_v45  ;;  %903 = vmatprep.mubr.f32.mxu0 %v700_v46 }
  0xbb   : > { %1048 = vmatprep.mubr.f32.mxu1 %v702_v21  ;;  %1265 = vperm.xlu0 %2951, %v1133_v16   ;;  %v1129_v21 = vld [vmem:[%s4259_s6 + $0x90] sm:$0xff] }
  0xbc   : > { %1185 = vperm.xlu1 %2952, %v1117_v25  }
  0xbd   : > { %904 = vmatmul.mubr.f32.gmra.mxu0 %v699_v47 }
  0xbe   : > { %1049 = vmatmul.mubr.f32.gmra.mxu1 %v701_v48  ;;  %908 = vmatprep.mubr.f32.mxu0 %v704_v49  ;;  %v1113_v48 = vld [vmem:[%s4259_s6 + $0x10] sm:$0xff] }
  0xbf   : > { %1053 = vmatprep.mubr.f32.mxu1 %v706_v30  ;;  %1260 = vperm.xlu0 %2951, %v1132_v20  }
  0xc0   : > { %1180 = vperm.xlu1 %2952, %v1116_v23  }
  0xc1   : > { %909 = vmatmul.mubr.f32.gmra.mxu0 %v703_v37 }
  0xc2   : > { %1054 = vmatmul.mubr.f32.gmra.mxu1 %v705_v40  ;;  %913 = vmatprep.mubr.f32.mxu0 %v708_v50 }
  0xc3   : > { %1058 = vmatprep.mubr.f32.mxu1 %v710_v51  ;;  %1255 = vperm.xlu0 %2951, %v1131_v29  }
  0xc4   : > { %1175 = vperm.xlu1 %2952, %v1115_v19  }
  0xc5   : > { %914 = vmatmul.mubr.f32.gmra.mxu0 %v707_v2  ;;  %v1128_v2 = vld [vmem:[%s4259_s6 + $0x88] sm:$0xff] }
  0xc6   : > { %1059 = vmatmul.mubr.f32.gmra.mxu1 %v709_v52  ;;  %918 = vmatprep.mubr.f32.mxu0 %v712_v53  ;;  %v1112_v53 = vld [vmem:[%s4259_s6 + $0x8] sm:$0xff] }
  0xc7   : > { %1063 = vmatprep.mubr.f32.mxu1 %v714_v54  ;;  %1250 = vperm.xlu0 %2951, %v1130_v42  }
  0xc8   : > { %1170 = vperm.xlu1 %2952, %v1114_v43  }
  0xc9   : > { %919 = vmatmul.mubr.f32.gmra.mxu0 %v711_v55 }
  0xca   : > { %1064 = vmatmul.mubr.f32.gmra.mxu1 %v713_v56  ;;  %2719 = vmatprep.mubr.f32.mxu0 %v1069_v61 }
  0xcb   : > { %1245 = vperm.xlu0 %2951, %v1129_v21  }
  0xcc   : > { %1165 = vperm.xlu1 %2952, %v1113_v48  }
  0xcf   : > { %1240 = vperm.xlu0 %2951, %v1128_v2  }
  0xd0   : > { %1160 = vperm.xlu1 %2952, %v1112_v53  }
  0xd3   : > { %1235 = vperm.xlu0 %2951, %v1127_v59  }
  0xd4   : > { %1155 = vperm.xlu1 %2952, %v1111_v60  }
  0xd7   : > { %1360 = vperm.xlu0 %2951, %v1152_v0   ;;  %v1715_v0 = vld [vmem:[%s4259_s6 + $0x160] sm:$0xff] }
  0xd8   : > { %1355 = vperm.xlu1 %2952, %v1151_v12  }
  0xdb   : > { %1350 = vperm.xlu0 %2951, %v1150_v7   ;;  %v1714_v7 = vld [vmem:[%s4259_s6 + $0x158] sm:$0xff] }
  0xdc   : > { %1345 = vperm.xlu1 %2952, %v1149_v13  }
 0x14d   : > { %v2401_v32 = vpop.f32.mrf.mxu0 }
 0x14e   : > { %v2481_v22 = vpop.f32.mrf.mxu1 }
 0x14f   : > { %v2402_v5 = vpop.f32.mrf.mxu0 }
 0x150   : > { %v2403_v24 = vadd.f32 %v2402_v5, %v2401_v32  ;;  %v2482_v26 = vpop.f32.mrf.mxu1  ;;  %v1148_v32 = vld [vmem:[%s4259_s6 + $0x128] sm:$0xff] }
 0x151   : > { %v2483_v27 = vadd.f32 %v2482_v26, %v2481_v22  ;;  %v2404_v28 = vpop.f32.mrf.mxu0  ;;  %v1147_v22 = vld [vmem:[%s4259_s6 + $0x120] sm:$0xff]  ;;  %1340 = vperm.xlu0 %2951, %v1148_v32   ;;  %v1146_v26 = vld [vmem:[%s4259_s6 + $0x118] sm:$0xff] }
 0x152   : > { %v2484_v31 = vpop.f32.mrf.mxu1  ;;  %1335 = vperm.xlu1 %2952, %v1147_v22  }
 0x153   : > { %v3808_v18 = vadd.f32 %v2483_v27, %v2403_v24  ;;  %v2405_v34 = vpop.f32.mrf.mxu0 }
 0x154   : > { %v2406_v35 = vadd.f32 %v2405_v34, %v2404_v28  ;;  %v2485_v36 = vpop.f32.mrf.mxu1  ;;  %v1145_v28 = vld [vmem:[%s4259_s6 + $0x110] sm:$0xff]  ;;  %v1144_v34 = vld [vmem:[%s4259_s6 + $0x108] sm:$0xff] }
 0x155   : > { %v2486_v10 = vadd.f32 %v2485_v36, %v2484_v31  ;;  %v2407_v41 = vpop.f32.mrf.mxu0  ;;  %1330 = vperm.xlu0 %2951, %v1146_v26   ;;  %v1143_v36 = vld [vmem:[%s4259_s6 + $0x100] sm:$0xff] }
 0x156   : > { %v2487_v15 = vpop.f32.mrf.mxu1  ;;  %1325 = vperm.xlu1 %2952, %v1145_v28  }
 0x157   : > { %v3816_v39 = vadd.f32 %v2486_v10, %v2406_v35  ;;  %v2408_v33 = vpop.f32.mrf.mxu0 }
 0x158   : > { %v2409_v38 = vadd.f32 %v2408_v33, %v2407_v41  ;;  %v2488_v44 = vpop.f32.mrf.mxu1  ;;  %v1722_v33 = vld [vmem:[%s4259_s6 + $0x198] sm:$0xff] }
 0x159   : > { %v2489_v45 = vadd.f32 %v2488_v44, %v2487_v15  ;;  %v2410_v46 = vpop.f32.mrf.mxu0  ;;  %1320 = vperm.xlu0 %2951, %v1144_v34   ;;  %v1723_v15 = vld [vmem:[%s4259_s6 + $0x1a0] sm:$0xf] }
 0x15a   : > { %v2490_v47 = vpop.f32.mrf.mxu1  ;;  %1315 = vperm.xlu1 %2952, %v1143_v36   ;;  %v1713_v36 = vld [vmem:[%s4259_s6 + $0x150] sm:$0xff] }
 0x15b   : > { %v3824_v49 = vadd.f32 %v2489_v45, %v2409_v38  ;;  %v2411_v30 = vpop.f32.mrf.mxu0 }
 0x15c   : > { %v2412_v37 = vadd.f32 %v2411_v30, %v2410_v46  ;;  %v2491_v40 = vpop.f32.mrf.mxu1  ;;  %v1721_v46 = vld [vmem:[%s4259_s6 + $0x190] sm:$0xff] }
 0x15d   : > { %v2492_v50 = vadd.f32 %v2491_v40, %v2490_v47  ;;  %v2413_v51 = vpop.f32.mrf.mxu0  ;;  %1776 = vperm.xlu0 %2951, %v1723_v15   ;;  %v1720_v47 = vld [vmem:[%s4259_s6 + $0x188] sm:$0xff]  ;;  %v1719_v40 = vld [vmem:[%s4259_s6 + $0x180] sm:$0xff] }
 0x15e   : > { %v2493_v52 = vpop.f32.mrf.mxu1  ;;  %1771 = vperm.xlu1 %2952, %v1722_v33   ;;  %v2067_v15 = vld [vmem:[%s4259_s6 + $0x1a8] sm:$0xff] }
 0x15f   : > { %v3832_v54 = vadd.f32 %v2492_v50, %v2412_v37  ;;  %v2414_v55 = vpop.f32.mrf.mxu0 }
 0x160   : > { %v2415_v56 = vadd.f32 %v2414_v55, %v2413_v51  ;;  %v2494_v57 = vpop.f32.mrf.mxu1  ;;  %v1718_v51 = vld [vmem:[%s4259_s6 + $0x178] sm:$0xff]  ;;  %v1717_v55 = vld [vmem:[%s4259_s6 + $0x170] sm:$0xff] }
 0x161   : > { %v2495_v11 = vadd.f32 %v2494_v57, %v2493_v52  ;;  %v3834_v58 = vpop.f32.mrf.mxu0  ;;  %1766 = vperm.xlu0 %2951, %v1721_v46   ;;  %v1716_v57 = vld [vmem:[%s4259_s6 + $0x168] sm:$0xff] }
 0x162   : > { %v3839_v4 = vpop.f32.mrf.mxu1  ;;  %1761 = vperm.xlu1 %2952, %v1720_v47  }
 0x163   : > { %v3844_v61 = vadd.f32 %v2495_v11, %v2415_v56  ;;  %v3846_v3 = vpop.f32.mrf.mxu0 }
 0x164   : > { %v3848_v62 = vpop.f32.mrf.mxu1 }
 0x165   : > { %v3850_v63 = vpop.f32.mrf.mxu0  ;;  %1756 = vperm.xlu0 %2951, %v1719_v40  }
 0x166   : > { %v3855_v1 = vpop.f32.mrf.mxu1  ;;  %1751 = vperm.xlu1 %2952, %v1718_v51  }
 0x167   : > { %v3860_v6 = vpop.f32.mrf.mxu0 }
 0x168   : > { %v3862_v8 = vpop.f32.mrf.mxu1 }
 0x169   : > { %v3864_v9 = vpop.f32.mrf.mxu0  ;;  %1746 = vperm.xlu0 %2951, %v1717_v55  }
 0x16a   : > { %v3869_v17 = vpop.f32.mrf.mxu1  ;;  %1741 = vperm.xlu1 %2952, %v1716_v57  }
 0x16b   : > { %v3874_v14 = vpop.f32.mrf.mxu0 }
 0x16c   : > { %v3876_v16 = vpop.f32.mrf.mxu1 }
 0x16d   : > { %v3878_v25 = vpop.f32.mrf.mxu0  ;;  %1736 = vperm.xlu0 %2951, %v1715_v0   ;;  %v1092_v0 = vld [vmem:[#allocation6 + $0xb8] sm:$0xff] }
 0x16e   : > { %v3883_v20 = vpop.f32.mrf.mxu1  ;;  %1731 = vperm.xlu1 %2952, %v1714_v7   ;;  %v1094_v7 = vld [vmem:[#allocation6 + $0xc8] sm:$0xff] }
 0x16f   : > { %v3888_v23 = vpop.f32.mrf.mxu0 }
 0x170   : > { %v3890_v5 = vpop.f32.mrf.mxu1 }
 0x171   : > { %v3892_v24 = vpop.f32.mrf.mxu0  ;;  %1726 = vperm.xlu0 %2951, %v1713_v36   ;;  %v1101_v36 = vld [vmem:[#allocation6 + $0x100] sm:$0xff] }
 0x172   : > { %v3897_v27 = vpop.f32.mrf.mxu1  ;;  %2072 = vperm.xlu1 %2952, %v2067_v15   ;;  %v1102_v15 = vld [vmem:[#allocation6 + $0x108] sm:$0xff] }
 0x173   : > { %v3902_v29 = vpop.f32.mrf.mxu0 }
 0x174   : > { %v3904_v31 = vpop.f32.mrf.mxu1 }
 0x175   : > { %v3906_v19 = vpop.f32.mrf.mxu0 }
 0x176   : > { %v3911_v35 = vpop.f32.mrf.mxu1 }
 0x177   : > { %v3916_v10 = vpop.f32.mrf.mxu0 }
 0x178   : > { %v3918_v41 = vpop.f32.mrf.mxu1 }
 0x179   : > { %v2434_v42 = vpop.f32.mrf.mxu0 }
 0x17a   : > { %v2514_v43 = vpop.f32.mrf.mxu1 }
 0x17b   : > { %v2435_v38 = vpop.f32.mrf.mxu0 }
 0x17c   : > { %v2515_v44 = vpop.f32.mrf.mxu1  ;;  %v2436_v57 = vadd.f32 %v2435_v38, %v2434_v42  ;;  %v2510_v42 = vadd.f32 %v3904_v31, %v3897_v27  ;;  %v2427_v38 = vadd.f32 %v3888_v23, %v3878_v25  ;;  %v2421_v27 = vadd.f32 %v3860_v6, %v3850_v63  ;;  %v1077_v63 = vld [vmem:[#allocation6 + $0x40] sm:$0xff]  ;;  %v1080_v6 = vld [vmem:[#allocation6 + $0x58] sm:$0xff] }
 0x17d   : > { %v2437_v45 = vpop.f32.mrf.mxu0  ;;  %v2501_v25 = vadd.f32 %v3862_v8, %v3855_v1  ;;  %v1079_v1 = vld [vmem:[#allocation6 + $0x50] sm:$0xff]  ;;  %v1082_v8 = vld [vmem:[#allocation6 + $0x68] sm:$0xff]  ;;  %v1084_v31 = vld [vmem:[#allocation6 + $0x78] sm:$0xff] }
 0x17e   : > { %v2517_v21 = vpop.f32.mrf.mxu1 }
 0x17f   : > { %v2438_v48 = vpop.f32.mrf.mxu0 }
 0x180   : > { %v2518_v30 = vpop.f32.mrf.mxu1  ;;  %v2439_v40 = vadd.f32 %v2438_v48, %v2437_v45  ;;  %v2433_v45 = vadd.f32 %v3916_v10, %v3906_v19  ;;  %v2507_v19 = vadd.f32 %v3890_v5, %v3883_v20  ;;  %v2424_v10 = vadd.f32 %v3874_v14, %v3864_v9  ;;  %v1083_v5 = vld [vmem:[#allocation6 + $0x70] sm:$0xff] }
 0x181   : > { %v2440_v37 = vpop.f32.mrf.mxu0  ;;  %v2519_v51 = vadd.f32 %v2518_v30, %v2517_v21  ;;  %v2513_v21 = vadd.f32 %v3918_v41, %v3911_v35  ;;  %v2430_v30 = vadd.f32 %v3902_v29, %v3892_v24  ;;  %v2504_v24 = vadd.f32 %v3876_v16, %v3869_v17  ;;  %v1085_v41 = vld [vmem:[#allocation6 + $0x80] sm:$0xff] }
 0x182   : > { %v2520_v50 = vpop.f32.mrf.mxu1  ;;  %v1031_v23 = vadd.f32 %v2507_v19, %v2427_v38  ;;  %v2418_v20 = vadd.f32 %v3846_v3, %v3834_v58  ;;  %v2498_v9 = vadd.f32 %v3848_v62, %v3839_v4  ;;  %v1021_v17 = vadd.f32 %v2501_v25, %v2421_v27  ;;  %v1070_v58 = vld [vmem:[#allocation6 + $0x8] sm:$0xff]  ;;  %v1071_v4 = vld [vmem:[#allocation6 + $0x10] sm:$0xff]  ;;  %v1073_v3 = vld [vmem:[#allocation6 + $0x20] sm:$0xff] }
 0x183   : > { %v2441_v2 = vpop.f32.mrf.mxu0  ;;  %v1051_v48 = vadd.f32 %v2519_v51, %v2439_v40  ;;  %v1041_v35 = vadd.f32 %v2513_v21, %v2433_v45  ;;  %v1036_v29 = vadd.f32 %v2510_v42, %v2430_v30  ;;  %v1026_v14 = vadd.f32 %v2504_v24, %v2424_v10  ;;  %v1075_v62 = vld [vmem:[#allocation6 + $0x30] sm:$0xff]  ;;  %v1106_v40 = vld [vmem:[#allocation6 + $0x128] sm:$0xff]  ;;  %v3997_v45 = vpop.permute.xlu1 %1305 }
 0x184   : > { %v2521_v52 = vpop.f32.mrf.mxu1  ;;  %v2442_v33 = vadd.f32 %v2441_v2, %v2440_v37  ;;  %v1016_v16 = vadd.f32 %v2498_v9, %v2418_v20  ;;  %v1088_v2 = vld [vmem:[#allocation6 + $0x98] sm:$0xff]  ;;  %v1107_v51 = vld [vmem:[#allocation6 + $0x130] sm:$0xff] }
 0x185   : > { %v2443_v53 = vpop.f32.mrf.mxu0  ;;  %v2522_v46 = vadd.f32 %v2521_v52, %v2520_v50  ;;  %v1087_v50 = vld [vmem:[#allocation6 + $0x90] sm:$0xff]  ;;  %v1089_v52 = vld [vmem:[#allocation6 + $0xa0] sm:$0xff] }
 0x186   : > { %v2523_v56 = vpop.f32.mrf.mxu1 }
 0x187   : > { %v2444_v11 = vpop.f32.mrf.mxu0  ;;  %v1056_v37 = vadd.f32 %v2522_v46, %v2442_v33  ;;  %v1103_v33 = vld [vmem:[#allocation6 + $0x110] sm:$0xff]  ;;  %v1104_v46 = vld [vmem:[#allocation6 + $0x118] sm:$0xff] }
 0x188   : > { %v2524_v59 = vpop.f32.mrf.mxu1  ;;  %v2445_v26 = vadd.f32 %v2444_v11, %v2443_v53  ;;  %v2068_v53 = vld [vmem:[%s4259_s6 + $0x1b0] sm:$0xff]  ;;  %v2516_v11 = vadd.f32 %v2515_v44, %v2514_v43  ;;  %v1086_v44 = vld [vmem:[#allocation6 + $0x88] sm:$0xff] }
 0x189   : > { %v2446_v60 = vpop.f32.mrf.mxu0  ;;  %v2525_v28 = vadd.f32 %v2524_v59, %v2523_v56  ;;  %v2069_v56 = vld [vmem:[%s4259_s6 + $0x1b8] sm:$0x1f]  ;;  %2077 = vperm.xlu0 %2951, %v2068_v53   ;;  %v1090_v59 = vld [vmem:[#allocation6 + $0xa8] sm:$0xff]  ;;  %v1109_v53 = vld [vmem:[#allocation6 + $0x140] sm:$0xff] }
 0x18a   : > { %v2526_v12 = vpop.f32.mrf.mxu1  ;;  %2082 = vperm.xlu1 %2952, %v2069_v56   ;;  %v1046_v43 = vadd.f32 %v2516_v11, %v2436_v57  ;;  %v1110_v56 = vld [vmem:[#allocation6 + $0x148] sm:$0xff]  ;;  %v1681_v57 = vld [vmem:[#allocation7 + $0x8] sm:$0xff]  ;;  %v4264_v11 = vmov 0.0  }
 0x18b   : > { %v2447_v13 = vpop.f32.mrf.mxu0  ;;  %v1061_v55 = vadd.f32 %v2525_v28, %v2445_v26  ;;  %v1098_v26 = vld [vmem:[#allocation6 + $0xe8] sm:$0xff]  ;;  %v1099_v28 = vld [vmem:[#allocation6 + $0xf0] sm:$0xff]  ;;  %1877 = vmatprep.mubr.f32.mxu1 %v1681_v57 }
 0x18c   : > { %v2448_v32 = vadd.f32 %v2447_v13, %v2446_v60  ;;  %v2527_v22 = vpop.f32.mrf.mxu1  ;;  %v1091_v60 = vld [vmem:[#allocation6 + $0xb0] sm:$0xff] }
 0x18d   : > { %v2528_v34 = vadd.f32 %v2527_v22, %v2526_v12  ;;  %v1093_v12 = vld [vmem:[#allocation6 + $0xc0] sm:$0xff]  ;;  %v1095_v13 = vld [vmem:[#allocation6 + $0xd0] sm:$0xff] }
 0x18e   : > { %v1097_v22 = vld [vmem:[#allocation6 + $0xe0] sm:$0xff] }
 0x18f   : > { %v1066_v47 = vadd.f32 %v2528_v34, %v2448_v32  ;;  %v1096_v32 = vld [vmem:[#allocation6 + $0xd8] sm:$0xff] }
 0x190   : > { %v1100_v34 = vld [vmem:[#allocation6 + $0xf8] sm:$0xff] }
 0x191   : > { %2687 = vmatprep.subr.mxu0 %v1066_v47 }
 0x192   : > { %2688 = vmatpush3.msra.mxu0 %v1066_v47  ;;  %v1105_v47 = vld [vmem:[#allocation6 + $0x120] sm:$0xff] }
 0x193   : > { %2689 = vmatprep.subr.mxu0 %v1061_v55 }
 0x194   : > { %2690 = vmatpush3.msra.mxu0 %v1061_v55  ;;  %v1108_v55 = vld [vmem:[#allocation6 + $0x138] sm:$0xff] }
 0x195   : > { %2691 = vmatprep.subr.mxu0 %v1056_v37 }
 0x196   : > { %2692 = vmatpush3.msra.mxu0 %v1056_v37  ;;  %v1311_v37 = vpop.permute.xlu0 %1310 }
 0x197   : > { %2693 = vmatprep.subr.mxu0 %v1051_v48 }
 0x198   : > { %2694 = vmatpush3.msra.mxu0 %v1051_v48  ;;  %v1226_v48 = vpop.permute.xlu1 %1225 }
 0x199   : > { %2695 = vmatprep.subr.mxu0 %v1046_v43 }
 0x19a   : > { %2696 = vmatpush3.msra.mxu0 %v1046_v43  ;;  %v1231_v21 = vpop.permute.xlu0 %1230 }
 0x19b   : > { %2697 = vmatprep.subr.mxu0 %v1041_v35 }
 0x19c   : > { %2698 = vmatpush3.msra.mxu0 %v1041_v35  ;;  %v1221_v43 = vpop.permute.xlu1 %1220 }
 0x19d   : > { %2699 = vmatprep.subr.mxu0 %v1036_v29 }
 0x19e   : > { %2700 = vmatpush3.msra.mxu0 %v1036_v29  ;;  %v1301_v30 = vpop.permute.xlu0 %1300 }
 0x19f   : > { %2701 = vmatprep.subr.mxu0 %v1031_v23 }
 0x1a0   : > { %2702 = vmatpush3.msra.mxu0 %v1031_v23  ;;  %v1216_v24 = vpop.permute.xlu1 %1215 }
 0x1a1   : > { %2703 = vmatprep.subr.mxu0 %v1026_v14 }
 0x1a2   : > { %2704 = vmatpush3.msra.mxu0 %v1026_v14  ;;  %v1296_v35 = vpop.permute.xlu0 %1295 }
 0x1a3   : > { %2705 = vmatprep.subr.mxu0 %v1021_v17 }
 0x1a4   : > { %2706 = vmatpush3.msra.mxu0 %v1021_v17  ;;  %v4015_v20 = vpop.permute.xlu1 %1210 }
 0x1a5   : > { %2707 = vmatprep.subr.mxu0 %v1016_v16 }
 0x1a6   : > { %2708 = vmatpush3.msra.mxu0 %v1016_v16  ;;  %v1291_v25 = vpop.permute.xlu0 %1290 }
 0x1a7   : > { %2709 = vmatprep.subr.mxu0 %v3844_v61 }
 0x1a8   : > { %2710 = vmatpush3.msra.mxu0 %v3844_v61  ;;  %v1072_v61 = vld [vmem:[#allocation6 + $0x18] sm:$0xff] }
 0x1a9   : > { %2711 = vmatprep.subr.mxu0 %v3832_v54 }
 0x1aa   : > { %2712 = vmatpush3.msra.mxu0 %v3832_v54  ;;  %v1074_v54 = vld [vmem:[#allocation6 + $0x28] sm:$0xff]  ;;  %v4021_v17 = vpop.permute.xlu0 %1285 }
 0x1ab   : > { %2713 = vmatprep.subr.mxu0 %v3824_v49 }
 0x1ac   : > { %2714 = vmatpush3.msra.mxu0 %v3824_v49  ;;  %v1076_v49 = vld [vmem:[#allocation6 + $0x38] sm:$0xff] }
 0x1ad   : > { %2715 = vmatprep.subr.mxu0 %v3816_v39 }
 0x1ae   : > { %2716 = vmatpush3.msra.mxu0 %v3816_v39  ;;  %v1078_v39 = vld [vmem:[#allocation6 + $0x48] sm:$0xff] }
 0x1af   : > { %2717 = vmatprep.subr.mxu0 %v3808_v18 }
 0x1b0   : > { %2718 = vmatpush3.msra.mxu0 %v3808_v18  ;;  %v1081_v18 = vld [vmem:[#allocation6 + $0x60] sm:$0xff] }
 0x1b1   : > { %2720 = vmatmul.mubr.f32.vlgmr.msra.gmra.mxu0 %v1070_v58  ;;  %2835 = vmatprep.subr.mxu0 %v4264_v11  ;;  %v4025_v58 = vpop.permute.xlu1 %1205 }
 0x1b2   : > { %2722 = vmatprep.mubr.f32.mxu0 %v1071_v4 }
 0x1b5   : > { %2723 = vmatmul.mubr.f32.gmra.mxu0 %v1072_v61 }
 0x1b6   : > { %2725 = vmatprep.mubr.f32.mxu0 %v1073_v3  ;;  %v4029_v3 = vpop.permute.xlu0 %1280 }
 0x1b9   : > { %2726 = vmatmul.mubr.f32.gmra.mxu0 %v1074_v54 }
 0x1ba   : > { %2728 = vmatprep.mubr.f32.mxu0 %v1075_v62  ;;  %v4031_v62 = vpop.permute.xlu1 %1200 }
 0x1bd   : > { %2729 = vmatmul.mubr.f32.gmra.mxu0 %v1076_v49 }
 0x1be   : > { %2731 = vmatprep.mubr.f32.mxu0 %v1077_v63 }
 0x1c1   : > { %2732 = vmatmul.mubr.f32.gmra.mxu0 %v1078_v39  ;;  %v4033_v39 = vpop.permute.xlu0 %1275 }
 0x1c2   : > { %2734 = vmatprep.mubr.f32.mxu0 %v1079_v1 }
 0x1c5   : > { %2735 = vmatmul.mubr.f32.gmra.mxu0 %v1080_v6  ;;  %v4035_v6 = vpop.permute.xlu1 %1195 }
 0x1c6   : > { %2737 = vmatprep.mubr.f32.mxu0 %v1081_v18 }
 0x1c9   : > { %2738 = vmatmul.mubr.f32.gmra.mxu0 %v1082_v8 }
 0x1ca   : > { %2740 = vmatprep.mubr.f32.mxu0 %v1083_v5  ;;  %v4041_v5 = vpop.permute.xlu0 %1270 }
 0x1cd   : > { %2741 = vmatmul.mubr.f32.gmra.mxu0 %v1084_v31 }
 0x1ce   : > { %2743 = vmatprep.mubr.f32.mxu0 %v1085_v41  ;;  %v4045_v41 = vpop.permute.xlu1 %1190 }
 0x1d1   : > { %2744 = vmatmul.mubr.f32.gmra.mxu0 %v1086_v44 }
 0x1d2   : > { %2746 = vmatprep.mubr.f32.mxu0 %v1087_v50 }
 0x1d5   : > { %2747 = vmatmul.mubr.f32.gmra.mxu0 %v1088_v2  ;;  %v4051_v2 = vpop.permute.xlu0 %1265 }
 0x1d6   : > { %2749 = vmatprep.mubr.f32.mxu0 %v1089_v52 }
 0x1d9   : > { %2750 = vmatmul.mubr.f32.gmra.mxu0 %v1090_v59  ;;  %v4055_v59 = vpop.permute.xlu1 %1185 }
 0x1da   : > { %2752 = vmatprep.mubr.f32.mxu0 %v1091_v60 }
 0x1dd   : > { %2753 = vmatmul.mubr.f32.gmra.mxu0 %v1092_v0 }
 0x1de   : > { %2755 = vmatprep.mubr.f32.mxu0 %v1093_v12  ;;  %v4061_v12 = vpop.permute.xlu0 %1260 }
 0x1e1   : > { %2756 = vmatmul.mubr.f32.gmra.mxu0 %v1094_v7 }
 0x1e2   : > { %2758 = vmatprep.mubr.f32.mxu0 %v1095_v13  ;;  %v4063_v13 = vpop.permute.xlu1 %1180 }
 0x1e5   : > { %2759 = vmatmul.mubr.f32.gmra.mxu0 %v1096_v32 }
 0x1e6   : > { %2761 = vmatprep.mubr.f32.mxu0 %v1097_v22 }
 0x1e9   : > { %2762 = vmatmul.mubr.f32.gmra.mxu0 %v1098_v26  ;;  %v4065_v26 = vpop.permute.xlu0 %1255 }
 0x1ea   : > { %2764 = vmatprep.mubr.f32.mxu0 %v1099_v28 }
 0x1ed   : > { %2765 = vmatmul.mubr.f32.gmra.mxu0 %v1100_v34  ;;  %v4067_v34 = vpop.permute.xlu1 %1175 }
 0x1ee   : > { %2767 = vmatprep.mubr.f32.mxu0 %v1101_v36 }
 0x1f1   : > { %2768 = vmatmul.mubr.f32.gmra.mxu0 %v1102_v15 }
 0x1f2   : > { %2770 = vmatprep.mubr.f32.mxu0 %v1103_v33  ;;  %v4069_v33 = vpop.permute.xlu0 %1250 }
 0x1f5   : > { %2771 = vmatmul.mubr.f32.gmra.mxu0 %v1104_v46 }
 0x1f6   : > { %2773 = vmatprep.mubr.f32.mxu0 %v1105_v47 }
 0x1f9   : > { %2774 = vmatmul.mubr.f32.gmra.mxu0 %v1106_v40  ;;  %v4071_v40 = vpop.permute.xlu1 %1170 }
 0x1fa   : > { %2776 = vmatprep.mubr.f32.mxu0 %v1107_v51 }
 0x1fd   : > { %2777 = vmatmul.mubr.f32.gmra.mxu0 %v1108_v55 }
 0x1fe   : > { %2779 = vmatprep.mubr.f32.mxu0 %v1109_v53 }
 0x201   : > { %2780 = vmatmul.mubr.f32.gmra.mxu0 %v1110_v56 }
 0x202   : > { %2857 = vmatprep.mubr.msk.f32.mxu0 %vm3077_vm1, %v4264_v11 }
 0x271   : > { %v3999_v42 = vpop.f32.mrf.mxu0 }
 0x272   : > { %4271 = vst [vmem:[#allocation12_spill] sm:$0xff] %v3999_v42 }
 0x273   : > { %v4001_v38 = vpop.f32.mrf.mxu0 }
 0x274   : > { %4272 = vst [vmem:[#allocation13_spill] sm:$0xff] %v4001_v38 }
 0x275   : > { %v4003_v19 = vpop.f32.mrf.mxu0 }
 0x276   : > { %4273 = vst [vmem:[#allocation14_spill] sm:$0xff] %v4003_v19 }
 0x277   : > { %v4005_v10 = vpop.f32.mrf.mxu0 }
 0x278   : > { %4274 = vst [vmem:[#allocation15_spill] sm:$0xff] %v4005_v10 }
 0x279   : > { %v4007_v29 = vpop.f32.mrf.mxu0 }
 0x27b   : > { %v4009_v27 = vpop.f32.mrf.mxu0 }
 0x27d   : > { %v4013_v23 = vpop.f32.mrf.mxu0 }
 0x27f   : > { %v4017_v9 = vpop.f32.mrf.mxu0 }
 0x281   : > { %v4019_v14 = vpop.f32.mrf.mxu0 }
 0x283   : > { %v4023_v16 = vpop.f32.mrf.mxu0 }
 0x285   : > { %v2736_v4 = vpop.f32.mrf.mxu0 }
 0x287   : > { %v4027_v61 = vpop.f32.mrf.mxu0 }
 0x289   : > { %v2739_v54 = vpop.f32.mrf.mxu0 }
 0x28a   : > { %v1495_v38 = vadd.f32 %v2739_v54, %v1221_v43 }
 0x28b   : > { %v1489_v49 = vpop.f32.mrf.mxu0 }
 0x28c   : > { %v1651_v43 = vmax.f32 %v1495_v38, 0.0  ;;  %v1475_v38 = vadd.f32 %v4019_v14, %v4031_v62  ;;  %v1465_v14 = vadd.f32 %v4013_v23, %v4045_v41  ;;  %v1455_v23 = vadd.f32 %v4007_v29, %v4063_v13  ;;  %v4278_v29 = vld [vmem:[#allocation14_spill] sm:$0xff] }
 0x28d   : > { %v2742_v63 = vpop.f32.mrf.mxu0  ;;  %v1445_v13 = vadd.f32 %v4278_v29, %v4071_v40 }
 0x28e   : > { %v1505_v46 = vadd.f32 %v2742_v63, %v1231_v21  ;;  %v1490_v21 = vadd.f32 %v1489_v49, %v1216_v24  ;;  %v1480_v24 = vadd.f32 %v4027_v61, %v4025_v58  ;;  %v1470_v61 = vadd.f32 %v4023_v16, %v4035_v6 }
 0x28f   : > { %v1499_v1 = vpop.f32.mrf.mxu0  ;;  %v1647_v62 = vmax.f32 %v1475_v38, 0.0  ;;  %v1460_v16 = vadd.f32 %v4017_v9, %v4055_v59  ;;  %v1645_v41 = vmax.f32 %v1465_v14, 0.0  ;;  %v1450_v9 = vadd.f32 %v4009_v27, %v4067_v34  ;;  %v4280_v27 = vld [vmem:[#allocation15_spill] sm:$0xff] }
 0x290   : > { %v1500_v55 = vadd.f32 %v1499_v1, %v1226_v48  ;;  %v1650_v49 = vmax.f32 %v1490_v21, 0.0  ;;  %v1646_v6 = vmax.f32 %v1470_v61, 0.0 }
 0x291   : > { %v4037_v18 = vpop.f32.mrf.mxu0  ;;  %v1644_v59 = vmax.f32 %v1460_v16, 0.0  ;;  %v1687_v16 = vld [vmem:[#allocation7 + $0x38] sm:$0xff] }
 0x292   : > { %4275 = vst [vmem:[#allocation16_spill] sm:$0xff] %v4037_v18  ;;  %v4076_v18 = vpop.permute.xlu0 %1245  ;;  %v1652_v63 = vmax.f32 %v1500_v55, 0.0  ;;  %v1643_v55 = vmax.f32 %v1455_v23, 0.0  ;;  %v1686_v23 = vld [vmem:[#allocation7 + $0x30] sm:$0xff] }
 0x293   : > { %v4039_v8 = vpop.f32.mrf.mxu0 }
 0x294   : > { %4276 = vst [vmem:[#allocation17_spill] sm:$0xff] %v4039_v8  ;;  %v1653_v8 = vmax.f32 %v1505_v46, 0.0 }
 0x295   : > { %v4043_v31 = vpop.f32.mrf.mxu0 }
 0x297   : > { %v4047_v44 = vpop.f32.mrf.mxu0 }
 0x298   : > { %4277 = vst [vmem:[#allocation18_spill] sm:$0xff] %v4047_v44 }
 0x299   : > { %v4049_v50 = vpop.f32.mrf.mxu0 }
 0x29b   : > { %v4053_v52 = vpop.f32.mrf.mxu0 }
 0x29d   : > { %v4057_v60 = vpop.f32.mrf.mxu0 }
 0x29f   : > { %v4059_v0 = vpop.f32.mrf.mxu0 }
 0x2a1   : > { %v2757_v7 = vpop.f32.mrf.mxu0 }
 0x2a3   : > { %v1549_v32 = vpop.f32.mrf.mxu0 }
 0x2a5   : > { %v2760_v22 = vpop.f32.mrf.mxu0 }
 0x2a6   : > { %v1565_v48 = vadd.f32 %v2760_v22, %v1291_v25  ;;  %v1241_v25 = vpop.permute.xlu0 %1240  ;;  %v1648_v22 = vmax.f32 %v1480_v24, 0.0 }
 0x2a7   : > { %v1559_v28 = vpop.f32.mrf.mxu0 }
 0x2a9   : > { %v2763_v36 = vpop.f32.mrf.mxu0 }
 0x2aa   : > { %v1575_v56 = vadd.f32 %v2763_v36, %v1301_v30 }
 0x2ab   : > { %v1569_v15 = vpop.f32.mrf.mxu0 }
 0x2ac   : > { %v1570_v10 = vadd.f32 %v1569_v15, %v1296_v35  ;;  %v1667_v30 = vmax.f32 %v1575_v56, 0.0  ;;  %v1560_v35 = vadd.f32 %v1559_v28, %v4021_v17  ;;  %v1550_v17 = vadd.f32 %v1549_v32, %v4033_v39  ;;  %v1236_v39 = vpop.permute.xlu0 %1235 }
 0x2ad   : > { %v2766_v47 = vpop.f32.mrf.mxu0  ;;  %v1540_v32 = vadd.f32 %v4059_v0, %v4051_v2  ;;  %v1530_v2 = vadd.f32 %v4053_v52, %v4065_v26  ;;  %v4279_v26 = vld [vmem:[#allocation18_spill] sm:$0xff] }
 0x2ae   : > { %v1585_v51 = vadd.f32 %v2766_v47, %v1311_v37  ;;  %v4080_v37 = vpop.permute.xlu1 %1165  ;;  %v1664_v58 = vmax.f32 %v1560_v35, 0.0  ;;  %v1662_v36 = vmax.f32 %v1550_v17, 0.0 }
 0x2af   : > { %v1579_v53 = vpop.f32.mrf.mxu0  ;;  %v1660_v0 = vmax.f32 %v1540_v32, 0.0  ;;  %v1658_v56 = vmax.f32 %v1530_v2, 0.0  ;;  %v1440_v34 = vadd.f32 %v4280_v27, %v4080_v37  ;;  %v1690_v2 = vld [vmem:[#allocation7 + $0x50] sm:$0xff]  ;;  %v1701_v27 = vld [vmem:[#allocation7 + $0xa8] sm:$0xff] }
 0x2b0   : > { %v1669_v57 = vmax.f32 %v1585_v51, 0.0  ;;  %v1580_v11 = vadd.f32 %v1579_v53, %v3997_v45  ;;  %v1485_v45 = vadd.f32 %v2736_v4, %v4015_v20  ;;  %v1361_v47 = vpop.permute.xlu0 %1360  ;;  %v1520_v53 = vadd.f32 %v4279_v26, %v4076_v18  ;;  %v1695_v26 = vld [vmem:[#allocation7 + $0x78] sm:$0xff] }
 0x2b1   : > { %v4074_v42 = vpop.f32.mrf.mxu0 }
 0x2b2   : > { %v1668_v44 = vmax.f32 %v1580_v11, 0.0  ;;  %2587 = vmatprep.subr.mxu1 %v1669_v57  ;;  %v1666_v11 = vmax.f32 %v1570_v10, 0.0  ;;  %v1649_v20 = vmax.f32 %v1485_v45, 0.0  ;;  %v1161_v10 = vpop.permute.xlu1 %1160  ;;  %v1642_v57 = vmax.f32 %v1450_v9, 0.0 }
 0x2b3   : > { %v4078_v19 = vpop.f32.mrf.mxu0  ;;  %2588 = vmatpush3.msra.mxu1 %v1653_v8  ;;  %v1555_v8 = vadd.f32 %v2757_v7, %v4029_v3  ;;  %v1545_v3 = vadd.f32 %v4057_v60, %v4041_v5  ;;  %v1535_v60 = vadd.f32 %v4049_v50, %v4061_v12  ;;  %v1525_v50 = vadd.f32 %v4043_v31, %v4069_v33  ;;  %v4281_v31 = vld [vmem:[#allocation16_spill] sm:$0xff] }
 0x2b4   : > { %2589 = vmatprep.subr.mxu1 %v1668_v44  ;;  %v1665_v44 = vmax.f32 %v1565_v48, 0.0  ;;  %v1515_v33 = vadd.f32 %v4281_v31, %v1241_v25  ;;  %v4282_v48 = vld [vmem:[#allocation12_spill] sm:$0xff]  ;;  %v1351_v45 = vpop.permute.xlu0 %1350  ;;  %v1656_v18 = vmax.f32 %v1520_v53, 0.0  ;;  %v1699_v53 = vld [vmem:[#allocation7 + $0x98] sm:$0xff]  ;;  %v1708_v31 = vld [vmem:[#allocation7 + $0xe0] sm:$0xff] }
 0x2b5   : > { %v4083_v54 = vpop.f32.mrf.mxu0  ;;  %2590 = vmatpush3.msra.mxu1 %v1652_v63  ;;  %v1663_v7 = vmax.f32 %v1555_v8, 0.0  ;;  %v1661_v15 = vmax.f32 %v1545_v3, 0.0  ;;  %v1659_v12 = vmax.f32 %v1535_v60, 0.0  ;;  %v1657_v21 = vmax.f32 %v1525_v50, 0.0  ;;  %v1693_v50 = vld [vmem:[#allocation7 + $0x68] sm:$0xff] }
 0x2b6   : > { %2591 = vmatprep.subr.mxu1 %v1667_v30  ;;  %v1156_v5 = vpop.permute.xlu1 %1155  ;;  %v1435_v40 = vadd.f32 %v4282_v48, %v1161_v10  ;;  %v1641_v30 = vmax.f32 %v1445_v13, 0.0  ;;  %v1655_v8 = vmax.f32 %v1515_v33, 0.0  ;;  %v1707_v33 = vld [vmem:[#allocation7 + $0xd8] sm:$0xff]  ;;  %v1682_v48 = vld [vmem:[#allocation7 + $0x10] sm:$0xff] }
 0x2b7   : > { %v4088_v1 = vpop.f32.mrf.mxu0  ;;  %2592 = vmatpush3.msra.mxu1 %v1651_v43  ;;  %v4283_v43 = vld [vmem:[#allocation17_spill] sm:$0xff] }
 0x2b8   : > { %2593 = vmatprep.subr.mxu1 %v1666_v11  ;;  %v1510_v35 = vadd.f32 %v4283_v43, %v1236_v39  ;;  %v4284_v11 = vld [vmem:[#allocation13_spill] sm:$0xff]  ;;  %v1639_v25 = vmax.f32 %v1435_v40, 0.0  ;;  %v1341_v61 = vpop.permute.xlu0 %1340  ;;  %v1685_v40 = vld [vmem:[#allocation7 + $0x28] sm:$0xff] }
 0x2b9   : > { %v4093_v4 = vpop.f32.mrf.mxu0  ;;  %2594 = vmatpush3.msra.mxu1 %v1650_v49  ;;  %v1430_v24 = vadd.f32 %v4284_v11, %v1156_v5  ;;  %v1640_v49 = vmax.f32 %v1440_v34, 0.0  ;;  %v1705_v34 = vld [vmem:[#allocation7 + $0xc8] sm:$0xff]  ;;  %v1694_v43 = vld [vmem:[#allocation7 + $0x70] sm:$0xff]  ;;  %v1703_v11 = vld [vmem:[#allocation7 + $0xb8] sm:$0xff] }
 0x2ba   : > { %2595 = vmatprep.subr.mxu1 %v1665_v44  ;;  %v1356_v52 = vpop.permute.xlu1 %1355 }
 0x2bb   : > { %2596 = vmatpush3.msra.mxu1 %v1649_v20  ;;  %v4100_v28 = vpop.f32.mrf.mxu0  ;;  %v1654_v20 = vmax.f32 %v1510_v35, 0.0  ;;  %v1638_v10 = vmax.f32 %v1430_v24, 0.0  ;;  %v1697_v35 = vld [vmem:[#allocation7 + $0x88] sm:$0xff]  ;;  %v1706_v24 = vld [vmem:[#allocation7 + $0xd0] sm:$0xff] }
 0x2bc   : > { %2597 = vmatprep.subr.mxu1 %v1664_v58  ;;  %v1680_v58 = vld [vmem:[#allocation7] sm:$0xff]  ;;  %v1331_v60 = vpop.permute.xlu0 %1330 }
 0x2bd   : > { %2598 = vmatpush3.msra.mxu1 %v1648_v22  ;;  %v2778_v46 = vpop.f32.mrf.mxu0  ;;  %v1684_v22 = vld [vmem:[#allocation7 + $0x20] sm:$0xff] }
 0x2be   : > { %2599 = vmatprep.subr.mxu1 %v1663_v7  ;;  %v1346_v37 = vpop.permute.xlu1 %1345  ;;  %v1625_v3 = vadd.f32 %v2778_v46, %v1351_v45  ;;  %v1691_v45 = vld [vmem:[#allocation7 + $0x58] sm:$0xff] }
 0x2bf   : > { %2600 = vmatpush3.msra.mxu1 %v1647_v62  ;;  %v1619_v51 = vpop.f32.mrf.mxu0  ;;  %v4285_v62 = vmov 0.0  }
 0x2c0   : > { %2601 = vmatprep.subr.mxu1 %v1662_v36  ;;  %v1620_v39 = vadd.f32 %v1619_v51, %v1346_v37  ;;  %v1683_v36 = vld [vmem:[#allocation7 + $0x18] sm:$0xff]  ;;  %v1677_v5 = vmax.f32 %v1625_v3, 0.0  ;;  %v1712_v37 = vld [vmem:[#allocation7 + $0x100] sm:$0xf] }
 0x2c1   : > { %2602 = vmatpush3.msra.mxu1 %v1646_v6  ;;  %v2781_v63 = vpop.f32.mrf.mxu0  ;;  %v1615_v6 = vadd.f32 %v4093_v4, %v1341_v61 }
 0x2c2   : > { %2603 = vmatprep.subr.mxu1 %v1661_v15  ;;  %v1635_v38 = vadd.f32 %v2781_v63, %v1361_v47  ;;  %v1336_v14 = vpop.permute.xlu1 %1335  ;;  %v1676_v46 = vmax.f32 %v1620_v39, 0.0  ;;  %v1321_v47 = vpop.permute.xlu0 %1320  ;;  %v1710_v63 = vld [vmem:[#allocation7 + $0xf0] sm:$0xf] }
 0x2c3   : > { %2604 = vmatpush3.msra.mxu1 %v1645_v41  ;;  %v1629_v44 = vpop.f32.mrf.mxu0  ;;  %v1610_v15 = vadd.f32 %v4100_v28, %v1336_v14  ;;  %v1675_v9 = vmax.f32 %v1615_v6, 0.0  ;;  %v1689_v28 = vld [vmem:[#allocation7 + $0x48] sm:$0xff] }
 0x2c4   : > { %2605 = vmatprep.subr.mxu1 %v1660_v0  ;;  %v1630_v17 = vadd.f32 %v1629_v44, %v1356_v52  ;;  %v1679_v7 = vmax.f32 %v1635_v38, 0.0  ;;  %v1605_v0 = vadd.f32 %v4083_v54, %v1331_v60 }
 0x2c5   : > { %2606 = vmatpush3.msra.mxu1 %v1644_v59  ;;  %v1674_v59 = vmax.f32 %v1610_v15, 0.0 }
 0x2c6   : > { %2607 = vmatprep.subr.mxu1 %v1659_v12  ;;  %v1678_v32 = vmax.f32 %v1630_v17, 0.0  ;;  %v1326_v41 = vpop.permute.xlu1 %1325  ;;  %v1595_v12 = vadd.f32 %v4074_v42, %v1321_v47  ;;  %v1673_v51 = vmax.f32 %v1605_v0, 0.0 }
 0x2c7   : > { %2608 = vmatpush3.msra.mxu1 %v1643_v55  ;;  %v1600_v4 = vadd.f32 %v4088_v1, %v1326_v41  ;;  %v1692_v1 = vld [vmem:[#allocation7 + $0x60] sm:$0xff] }
 0x2c8   : > { %2609 = vmatprep.subr.mxu1 %v1658_v56  ;;  %v1696_v55 = vld [vmem:[#allocation7 + $0x80] sm:$0xff]  ;;  %v1671_v52 = vmax.f32 %v1595_v12, 0.0  ;;  %v1702_v56 = vld [vmem:[#allocation7 + $0xb0] sm:$0xff] }
 0x2c9   : > { %2610 = vmatpush3.msra.mxu1 %v1642_v57  ;;  %v1672_v13 = vmax.f32 %v1600_v4, 0.0  ;;  %v1704_v57 = vld [vmem:[#allocation7 + $0xc0] sm:$0xff] }
 0x2ca   : > { %2611 = vmatprep.subr.mxu1 %v1657_v21  ;;  %v1316_v54 = vpop.permute.xlu1 %1315  ;;  %v1711_v21 = vld [vmem:[#allocation7 + $0xf8] sm:$0xf] }
 0x2cb   : > { %2612 = vmatpush3.msra.mxu1 %v1641_v30  ;;  %v1590_v29 = vadd.f32 %v4078_v19, %v1316_v54  ;;  %v1698_v19 = vld [vmem:[#allocation7 + $0x90] sm:$0xff]  ;;  %v1688_v30 = vld [vmem:[#allocation7 + $0x40] sm:$0xff] }
 0x2cc   : > { %2613 = vmatprep.subr.mxu1 %v1656_v18  ;;  %v1700_v18 = vld [vmem:[#allocation7 + $0xa0] sm:$0xff] }
 0x2cd   : > { %2614 = vmatpush3.msra.mxu1 %v1640_v49  ;;  %v1670_v42 = vmax.f32 %v1590_v29, 0.0  ;;  %v1709_v49 = vld [vmem:[#allocation7 + $0xe8] sm:$0xff] }
 0x2ce   : > { %2615 = vmatprep.subr.mxu1 %v1655_v8 }
 0x2cf   : > { %2616 = vmatpush3.msra.mxu1 %v1639_v25 }
 0x2d0   : > { %2617 = vmatprep.subr.mxu1 %v1654_v20 }
 0x2d1   : > { %2618 = vmatpush3.msra.mxu1 %v1638_v10 }
 0x2d2   : > { %1878 = vmatmul.mubr.f32.vlgmr.msra.gmra.mxu1 %v1680_v58  ;;  %2782 = vmatprep.subr.mxu1 %v4285_v62 }
 0x2d3   : > { %2783 = vmatpush3.msra.mxu1 %v1679_v7  ;;  %1882 = vmatprep.mubr.f32.mxu1 %v1684_v22 }
 0x2d4   : > { %2784 = vmatprep.subr.mxu1 %v4285_v62 }
 0x2d5   : > { %2785 = vmatpush3.msra.mxu1 %v1678_v32 }
 0x2d6   : > { %1883 = vmatmul.mubr.f32.gmra.mxu1 %v1683_v36  ;;  %2786 = vmatprep.subr.mxu1 %v4285_v62 }
 0x2d7   : > { %2787 = vmatpush3.msra.mxu1 %v1677_v5  ;;  %1887 = vmatprep.mubr.f32.mxu1 %v1687_v16 }
 0x2d8   : > { %2788 = vmatprep.subr.mxu1 %v4285_v62 }
 0x2d9   : > { %2789 = vmatpush3.msra.mxu1 %v1676_v46 }
 0x2da   : > { %1888 = vmatmul.mubr.f32.gmra.mxu1 %v1686_v23  ;;  %2790 = vmatprep.subr.mxu1 %v4285_v62 }
 0x2db   : > { %2791 = vmatpush3.msra.mxu1 %v1675_v9  ;;  %1892 = vmatprep.mubr.f32.mxu1 %v1690_v2 }
 0x2dc   : > { %2792 = vmatprep.subr.mxu1 %v4285_v62 }
 0x2dd   : > { %2793 = vmatpush3.msra.mxu1 %v1674_v59 }
 0x2de   : > { %1893 = vmatmul.mubr.f32.gmra.mxu1 %v1689_v28  ;;  %2794 = vmatprep.subr.mxu1 %v4285_v62 }
 0x2df   : > { %2795 = vmatpush3.msra.mxu1 %v1673_v51  ;;  %1897 = vmatprep.mubr.f32.mxu1 %v1693_v50 }
 0x2e0   : > { %2796 = vmatprep.subr.mxu1 %v4285_v62 }
 0x2e1   : > { %2797 = vmatpush3.msra.mxu1 %v1672_v13 }
 0x2e2   : > { %1898 = vmatmul.mubr.f32.gmra.mxu1 %v1692_v1  ;;  %2798 = vmatprep.subr.mxu1 %v4285_v62 }
 0x2e3   : > { %2799 = vmatpush3.msra.mxu1 %v1671_v52  ;;  %1902 = vmatprep.mubr.f32.mxu1 %v1696_v55 }
 0x2e4   : > { %2800 = vmatprep.subr.mxu1 %v4285_v62 }
 0x2e5   : > { %2801 = vmatpush3.msra.mxu1 %v1670_v42 }
 0x2e6   : > { %1903 = vmatmul.mubr.f32.gmra.mxu1 %v1695_v26  ;;  %2866 = vmatprep.subr.mxu1 %v4285_v62  ;;  %v1777_v26 = vpop.permute.xlu0 %1776 }
 0x2e7   : > { %1907 = vmatprep.mubr.f32.mxu1 %v1699_v53 }
 0x2ea   : > { %1908 = vmatmul.mubr.f32.gmra.mxu1 %v1698_v19 }
 0x2eb   : > { %1912 = vmatprep.mubr.f32.mxu1 %v1702_v56  ;;  %v1772_v56 = vpop.permute.xlu1 %1771 }
 0x2ee   : > { %1913 = vmatmul.mubr.f32.gmra.mxu1 %v1701_v27 }
 0x2ef   : > { %1917 = vmatprep.mubr.f32.mxu1 %v1705_v34  ;;  %v1767_v34 = vpop.permute.xlu0 %1766 }
 0x2f2   : > { %1918 = vmatmul.mubr.f32.gmra.mxu1 %v1704_v57 }
 0x2f3   : > { %1922 = vmatprep.mubr.f32.mxu1 %v1708_v31 }
 0x2f6   : > { %1923 = vmatmul.mubr.f32.gmra.mxu1 %v1707_v33 }
 0x2f7   : > { %1927 = vmatprep.mubr.f32.mxu1 %v1711_v21 }
 0x2fa   : > { %1928 = vmatmul.mubr.f32.gmra.mxu1 %v1710_v63  ;;  %v1762_v63 = vpop.permute.xlu1 %1761 }
 0x2fb   : > { %2802 = vmatprep.mubr.msk.f32.mxu1 %vm3077_vm1, %v4285_v62 }
 0x2fe   : > { %2803 = vmatmul.mubr.msk.f32.vlgmr.msra.gmra.mxu1 %vm1779_vm2, %v1682_v48 }
 0x2ff   : > { %2805 = vmatprep.mubr.msk.f32.mxu1 %vm3077_vm1, %v4285_v62 }
 0x302   : > { %2806 = vmatmul.mubr.msk.f32.gmra.mxu1 %vm1779_vm2, %v1685_v40 }
 0x303   : > { %2808 = vmatprep.mubr.msk.f32.mxu1 %vm3077_vm1, %v4285_v62 }
 0x306   : > { %2809 = vmatmul.mubr.msk.f32.gmra.mxu1 %vm1779_vm2, %v1688_v30  ;;  %v1757_v30 = vpop.permute.xlu0 %1756 }
 0x307   : > { %2811 = vmatprep.mubr.msk.f32.mxu1 %vm3077_vm1, %v4285_v62 }
 0x30a   : > { %2812 = vmatmul.mubr.msk.f32.gmra.mxu1 %vm1779_vm2, %v1691_v45 }
 0x30b   : > { %2814 = vmatprep.mubr.msk.f32.mxu1 %vm3077_vm1, %v4285_v62 }
 0x30e   : > { %2815 = vmatmul.mubr.msk.f32.gmra.mxu1 %vm1779_vm2, %v1694_v43 }
 0x30f   : > { %2817 = vmatprep.mubr.msk.f32.mxu1 %vm3077_vm1, %v4285_v62 }
 0x312   : > { %2818 = vmatmul.mubr.msk.f32.gmra.mxu1 %vm1779_vm2, %v1697_v35 }
 0x313   : > { %2820 = vmatprep.mubr.msk.f32.mxu1 %vm3077_vm1, %v4285_v62 }
 0x316   : > { %2821 = vmatmul.mubr.msk.f32.gmra.mxu1 %vm1779_vm2, %v1700_v18 }
 0x317   : > { %2823 = vmatprep.mubr.msk.f32.mxu1 %vm3077_vm1, %v4285_v62 }
 0x31a   : > { %2824 = vmatmul.mubr.msk.f32.gmra.mxu1 %vm1779_vm2, %v1703_v11 }
 0x31b   : > { %2826 = vmatprep.mubr.msk.f32.mxu1 %vm3077_vm1, %v4285_v62 }
 0x31e   : > { %2827 = vmatmul.mubr.msk.f32.gmra.mxu1 %vm1779_vm2, %v1706_v24 }
 0x31f   : > { %2829 = vmatprep.mubr.msk.f32.mxu1 %vm3077_vm1, %v4285_v62 }
 0x322   : > { %2830 = vmatmul.mubr.msk.f32.gmra.mxu1 %vm1779_vm2, %v1709_v49 }
 0x323   : > { %2832 = vmatprep.mubr.msk.f32.mxu1 %vm3077_vm1, %v4285_v62 }
 0x326   : > { %2833 = vmatmul.mubr.msk.f32.gmra.mxu1 %vm1779_vm2, %v1712_v37 }
 0x327   : > { %2863 = vmatprep.mubr.msk.f32.mxu1 %vm3077_vm1, %v4285_v62 }
 0x392   : > { %v2619_v8 = vpop.f32.mrf.mxu1 }
 0x394   : > { %v2620_v44 = vpop.f32.mrf.mxu1 }
 0x395   : > { %v4180_v25 = vadd.f32 %v2620_v44, %v2619_v8  ;;  %v1752_v44 = vpop.permute.xlu1 %1751 }
 0x396   : > { %v2622_v38 = vpop.f32.mrf.mxu1 }
 0x398   : > { %v2623_v20 = vpop.f32.mrf.mxu1 }
 0x399   : > { %v4182_v10 = vadd.f32 %v2623_v20, %v2622_v38 }
 0x39a   : > { %v2625_v17 = vpop.f32.mrf.mxu1 }
 0x39c   : > { %v2626_v58 = vpop.f32.mrf.mxu1 }
 0x39d   : > { %v4184_v61 = vadd.f32 %v2626_v58, %v2625_v17 }
 0x39e   : > { %v2628_v22 = vpop.f32.mrf.mxu1 }
 0x3a0   : > { %v2629_v3 = vpop.f32.mrf.mxu1 }
 0x3a1   : > { %v4186_v7 = vadd.f32 %v2629_v3, %v2628_v22  ;;  %v1747_v22 = vpop.permute.xlu0 %1746 }
 0x3a2   : > { %v2631_v14 = vpop.f32.mrf.mxu1 }
 0x3a4   : > { %v2632_v39 = vpop.f32.mrf.mxu1 }
 0x3a5   : > { %v4188_v32 = vadd.f32 %v2632_v39, %v2631_v14 }
 0x3a6   : > { %v2634_v36 = vpop.f32.mrf.mxu1 }
 0x3a8   : > { %v2635_v16 = vpop.f32.mrf.mxu1 }
 0x3a9   : > { %v2636_v6 = vadd.f32 %v2635_v16, %v2634_v36 }
 0x3aa   : > { %v2637_v5 = vpop.f32.mrf.mxu1 }
 0x3ab   : > { %v1905_v36 = vadd.f32 %v2636_v6, %v1752_v44 }
 0x3ac   : > { %v2638_v60 = vpop.f32.mrf.mxu1 }
 0x3ad   : > { %v2639_v24 = vadd.f32 %v2638_v60, %v2637_v5  ;;  %v1742_v60 = vpop.permute.xlu1 %1741 }
 0x3ae   : > { %v2640_v15 = vpop.f32.mrf.mxu1  ;;  %v1895_v6 = vadd.f32 %v4186_v7, %v1742_v60 }
 0x3af   : > { %v1910_v3 = vadd.f32 %v2639_v24, %v1757_v30 }
 0x3b0   : > { %v2641_v46 = vpop.f32.mrf.mxu1 }
 0x3b1   : > { %v2642_v43 = vadd.f32 %v2641_v46, %v2640_v15  ;;  %v1900_v15 = vadd.f32 %v4188_v32, %v1747_v22 }
 0x3b2   : > { %v2643_v23 = vpop.f32.mrf.mxu1 }
 0x3b3   : > { %v1915_v20 = vadd.f32 %v2642_v43, %v1762_v63 }
 0x3b4   : > { %v2644_v41 = vpop.f32.mrf.mxu1 }
 0x3b5   : > { %v2645_v40 = vadd.f32 %v2644_v41, %v2643_v23  ;;  %v1737_v41 = vpop.permute.xlu0 %1736 }
 0x3b6   : > { %v2646_v2 = vpop.f32.mrf.mxu1  ;;  %v1890_v32 = vadd.f32 %v4184_v61, %v1737_v41 }
 0x3b7   : > { %v1920_v49 = vadd.f32 %v2645_v40, %v1767_v34 }
 0x3b8   : > { %v2647_v0 = vpop.f32.mrf.mxu1 }
 0x3b9   : > { %v2648_v33 = vadd.f32 %v2647_v0, %v2646_v2 }
 0x3ba   : > { %v2649_v9 = vpop.f32.mrf.mxu1 }
 0x3bb   : > { %v1925_v35 = vadd.f32 %v2648_v33, %v1772_v56 }
 0x3bc   : > { %v2650_v4 = vpop.f32.mrf.mxu1 }
 0x3bd   : > { %v2651_v21 = vadd.f32 %v2650_v4, %v2649_v9 }
 0x3be   : > { %v4190_v59 = vpop.f32.mrf.mxu1 }
 0x3bf   : > { %v1930_v18 = vadd.f32 %v2651_v21, %v1777_v26 }
 0x3c0   : > { %v2804_v28 = vpop.f32.mrf.mxu1 }
 0x3c1   : > { %v1732_v28 = vpop.permute.xlu1 %1731 }
 0x3c2   : > { %v4192_v47 = vpop.f32.mrf.mxu1  ;;  %v1885_v7 = vadd.f32 %v4182_v10, %v1732_v28 }
 0x3c4   : > { %v2807_v50 = vpop.f32.mrf.mxu1 }
 0x3c6   : > { %v4194_v12 = vpop.f32.mrf.mxu1 }
 0x3c7   : > { %v2010_v50 = vadd.f32 %v4194_v12, %v1890_v32 }
 0x3c8   : > { %v2810_v51 = vpop.f32.mrf.mxu1 }
 0x3c9   : > { %v2055_v12 = vmax.f32 %v2010_v50, 0.0 }
 0x3ca   : > { %v4196_v54 = vpop.f32.mrf.mxu1 }
 0x3cb   : > { %v2015_v9 = vadd.f32 %v4196_v54, %v1895_v6  ;;  %v2005_v54 = vadd.f32 %v4192_v47, %v1885_v7  ;;  %v2066_v47 = vld [vmem:[%s4258_s5 + $0x10] sm:$0x1f] }
 0x3cc   : > { %v2813_v29 = vpop.f32.mrf.mxu1 }
 0x3cd   : > { %v1727_v29 = vpop.permute.xlu0 %1726 }
 0x3ce   : > { %v2019_v13 = vpop.f32.mrf.mxu1  ;;  %v1880_v61 = vadd.f32 %v4180_v25, %v1727_v29 }
 0x3cf   : > { %v2020_v2 = vadd.f32 %v2019_v13, %v1900_v15  ;;  %v2056_v13 = vmax.f32 %v2015_v9, 0.0 }
 0x3d0   : > { %v2816_v1 = vpop.f32.mrf.mxu1  ;;  %v2000_v10 = vadd.f32 %v4190_v59, %v1880_v61  ;;  %v2064_v59 = vld [vmem:[%s4258_s5] sm:$0xff] }
 0x3d1   : > { %v2057_v51 = vmax.f32 %v2020_v2, 0.0  ;;  %v2054_v1 = vmax.f32 %v2005_v54, 0.0  ;;  %v2078_v33 = vpop.permute.xlu0 %2077 }
 0x3d2   : > { %v2024_v55 = vpop.f32.mrf.mxu1  ;;  %v2053_v25 = vmax.f32 %v2000_v10, 0.0 }
 0x3d3   : > { %v2025_v46 = vadd.f32 %v2024_v55, %v1905_v36  ;;  %v2065_v55 = vld [vmem:[%s4258_s5 + $0x8] sm:$0xff] }
 0x3d4   : > { %v2819_v52 = vpop.f32.mrf.mxu1 }
 0x3d5   : > { %v2058_v4 = vmax.f32 %v2025_v46, 0.0  ;;  %v2073_v52 = vpop.permute.xlu1 %2072 }
 0x3d6   : > { %v2029_v42 = vpop.f32.mrf.mxu1 }
 0x3d7   : > { %v2030_v16 = vadd.f32 %v2029_v42, %v1910_v3 }
 0x3d8   : > { %v2822_v53 = vpop.f32.mrf.mxu1 }
 0x3d9   : > { %v2059_v0 = vmax.f32 %v2030_v16, 0.0  ;;  %v2083_v42 = vpop.permute.xlu1 %2082 }
 0x3da   : > { %v2034_v19 = vpop.f32.mrf.mxu1 }
 0x3db   : > { %v2035_v14 = vadd.f32 %v2034_v19, %v1915_v20 }
 0x3dc   : > { %v2825_v27 = vpop.f32.mrf.mxu1 }
 0x3dd   : > { %v2060_v23 = vmax.f32 %v2035_v14, 0.0 }
 0x3de   : > { %v2039_v57 = vpop.f32.mrf.mxu1 }
 0x3df   : > { %v2040_v17 = vadd.f32 %v2039_v57, %v1920_v49 }
 0x3e0   : > { %v2828_v31 = vpop.f32.mrf.mxu1 }
 0x3e1   : > { %v2061_v5 = vmax.f32 %v2040_v17, 0.0 }
 0x3e2   : > { %v2044_v48 = vpop.f32.mrf.mxu1 }
 0x3e3   : > { %v2045_v37 = vadd.f32 %v2044_v48, %v1925_v35 }
 0x3e4   : > { %v2831_v45 = vpop.f32.mrf.mxu1 }
 0x3e5   : > { %v2062_v39 = vmax.f32 %v2045_v37, 0.0 }
 0x3e6   : > { %v2049_v11 = vpop.f32.mrf.mxu1 }
 0x3e7   : > { %v2050_v8 = vadd.f32 %v2049_v11, %v1930_v18 }
 0x3e8   : > { %v2834_v38 = vpop.f32.mrf.mxu1 }
 0x3e9   : > { %v2063_v58 = vmax.f32 %v2050_v8, 0.0 }
 0x3eb   : > { %2836 = vmatpush3.msk.msra.mxu0 %vm2095_vm3, %v2063_v58  ;;  %2877 = vmatpush3.msk.msra.mxu1 %vm2095_vm3, %v2063_v58 }
 0x3ec   : > { %2837 = vmatprep.subr.mxu0 %v4285_v62  ;;  %2867 = vmatprep.subr.mxu1 %v4285_v62 }
 0x3ed   : > { %2838 = vmatpush3.msra.mxu0 %v2062_v39  ;;  %2878 = vmatpush3.msra.mxu1 %v2062_v39 }
 0x3ee   : > { %2839 = vmatprep.subr.mxu0 %v4285_v62  ;;  %2868 = vmatprep.subr.mxu1 %v4285_v62 }
 0x3ef   : > { %2840 = vmatpush3.msra.mxu0 %v2061_v5  ;;  %2879 = vmatpush3.msra.mxu1 %v2061_v5 }
 0x3f0   : > { %2841 = vmatprep.subr.mxu0 %v4285_v62  ;;  %2869 = vmatprep.subr.mxu1 %v4285_v62 }
 0x3f1   : > { %2842 = vmatpush3.msra.mxu0 %v2060_v23  ;;  %2880 = vmatpush3.msra.mxu1 %v2060_v23 }
 0x3f2   : > { %2843 = vmatprep.subr.mxu0 %v4285_v62  ;;  %2870 = vmatprep.subr.mxu1 %v4285_v62 }
 0x3f3   : > { %2844 = vmatpush3.msra.mxu0 %v2059_v0  ;;  %2881 = vmatpush3.msra.mxu1 %v2059_v0 }
 0x3f4   : > { %2845 = vmatprep.subr.mxu0 %v4285_v62  ;;  %2871 = vmatprep.subr.mxu1 %v4285_v62 }
 0x3f5   : > { %2846 = vmatpush3.msra.mxu0 %v2058_v4  ;;  %2882 = vmatpush3.msra.mxu1 %v2058_v4 }
 0x3f6   : > { %2847 = vmatprep.subr.mxu0 %v4285_v62  ;;  %2872 = vmatprep.subr.mxu1 %v4285_v62 }
 0x3f7   : > { %2848 = vmatpush3.msra.mxu0 %v2057_v51  ;;  %2883 = vmatpush3.msra.mxu1 %v2057_v51 }
 0x3f8   : > { %2849 = vmatprep.subr.mxu0 %v4285_v62  ;;  %2873 = vmatprep.subr.mxu1 %v4285_v62 }
 0x3f9   : > { %2850 = vmatpush3.msra.mxu0 %v2056_v13  ;;  %2884 = vmatpush3.msra.mxu1 %v2056_v13 }
 0x3fa   : > { %2851 = vmatprep.subr.mxu0 %v4285_v62  ;;  %2874 = vmatprep.subr.mxu1 %v4285_v62 }
 0x3fb   : > { %2852 = vmatpush3.msra.mxu0 %v2055_v12  ;;  %2885 = vmatpush3.msra.mxu1 %v2055_v12 }
 0x3fc   : > { %2853 = vmatprep.subr.mxu0 %v4285_v62  ;;  %2875 = vmatprep.subr.mxu1 %v4285_v62 }
 0x3fd   : > { %2854 = vmatpush3.msra.mxu0 %v2054_v1  ;;  %2886 = vmatpush3.msra.mxu1 %v2054_v1 }
 0x3fe   : > { %2855 = vmatprep.subr.mxu0 %v4285_v62  ;;  %2876 = vmatprep.subr.mxu1 %v4285_v62 }
 0x3ff   : > { %2856 = vmatpush3.msra.mxu0 %v2053_v25  ;;  %2887 = vmatpush3.msra.mxu1 %v2053_v25 }
 0x400   : > { %2858 = vmatmul.mubr.msk.f32.vlgmr.msra.gmra.mxu0 %vm2085_vm4, %v2064_v59  ;;  %2864 = vmatmul.mubr.msk.f32.vlgmr.msra.gmra.mxu1 %vm2085_vm4, %v2066_v47 }
 0x401   : > { %2860 = vmatprep.mubr.msk.f32.mxu0 %vm3077_vm1, %v4285_v62 }
 0x404   : > { %2861 = vmatmul.mubr.msk.f32.gmra.mxu0 %vm2085_vm4, %v2065_v55 }
 0x4c0   : > { %v2165_v26 = vpop.f32.mrf.mxu0  ;;  %v2175_v53 = vpop.f32.mrf.mxu1 }
 0x4c1   : > { %v2166_v19 = vadd.f32 %v2165_v26, %v2073_v52  ;;  %v2176_v56 = vadd.f32 %v2175_v53, %v2083_v42 }
 0x4c2   : > { %v2859_v27 = vpop.f32.mrf.mxu0  ;;  %v2865_v34 = vpop.f32.mrf.mxu1 }
 0x4c3   : > { %v2363_v57 = vmul.f32 -1.442695, %v2166_v19  ;;  %v2365_v31 = vmul.f32 -1.442695, %v2176_v56 }
 0x4c4   : > { %v2170_v21 = vpop.f32.mrf.mxu0 }
 0x4c5   : > { %2953 = vpow2.f32 %v2363_v57  ;;  %v2171_v62 = vadd.f32 %v2170_v21, %v2078_v33 }
 0x4c6   : > { %2955 = vpow2.f32 %v2365_v31  ;;  %v2862_v63 = vpop.f32.mrf.mxu0 }
 0x4c7   : > { %v2364_v48 = vmul.f32 -1.442695, %v2171_v62 }
 0x4c9   : > { %2957 = vpow2.f32 %v2364_v48 }
 0x4d2   : > { %v2954_v40 = vpop.eup %2953 }
 0x4d3   : > { %v2956_v30 = vpop.eup %2955  ;;  %v2188_v45 = vadd.f32 1.0, %v2954_v40 }
 0x4d4   : > { %v2190_v43 = vadd.f32 1.0, %v2956_v30 }
 0x4d5   : > { %2959 = vrcp.f32 %v2188_v45 }
 0x4d6   : > { %v2958_v35 = vpop.eup %2957  ;;  %2961 = vrcp.f32 %v2190_v43 }
 0x4d7   : > { %v2189_v18 = vadd.f32 1.0, %v2958_v35 }
 0x4d9   : > { %2963 = vrcp.f32 %v2189_v18 }
 0x4e2   : > { %v2960_v11 = vpop.eup %2959 }
 0x4e3   : > { %v2962_v24 = vpop.eup %2961  ;;  %2197 = vst.msk [vmem:[%s353_s13] sm:$0xff] %vm390_vm0, %v2960_v11 }
 0x4e4   : > { %2200 = vst.msk [vmem:[%s353_s13 + $0x10] sm:$0x1f] %vm2199_vm5, %v2962_v24 }
 0x4e6   : > { %v2964_v49 = vpop.eup %2963 }
 0x4e7   : > { %2198 = vst.msk [vmem:[%s353_s13 + $0x8] sm:$0xff] %vm390_vm0, %v2964_v49 }
 0x4e8 PF: > { %s20_s26 = sadd.s32 1, %s3066_s26   ;;  %s4286_s24 = smov %s3062_s25 }
 0x4e9   : > { %p17_p8 = scmp.ge.s32.totalorder %s20_s26, 4   ;;  %s4287_s25 = smov %s4289_s28 }
 0x4eb   :  { %19 = sbr.rel (!%p17_p8) target bundleno = 4 (0x4), region = 92 }
 0x4f0   :  { %2228 = vsyncpa [#allocation4], 1 }
 0x4f1   :  { %2230 = vsyncpa [#allocation4 + $0x1], 1 }
 0x4f2   :  { %2231 = vsyncpa [#allocation8], 1 }
 0x4f3   :  { %2232 = vsyncpa [#allocation5], 1 }
 0x4f4   :  { %2234 = vsyncpa [#allocation5 + $0x1], 1 }

</bundles_post_ra>
